<compile_context>
chip_gen: v7x
topology: tpu7x:2x2x1
jax: 0.10.0
libtpu: 0.0.40
codegen_flags: <defaults>
</compile_context>

<pallas_src>
import functools
import math

import jax
import jax.numpy as jnp
from jax.experimental import pallas as pl
from jax.experimental.pallas import tpu as pltpu

PAD = 0
NEG_INF = -1e18          # only applied to f32 scores (softmax path stays f32)
LN_EPS = 1e-5            # PyTorch nn.LayerNorm default
VMEM_LIMIT = 48 * 1024 * 1024


# --------------------------------------------------------------------------
# helpers
# --------------------------------------------------------------------------
def _pick_tile_t(T):
    for cand in (256, 128):
        if T % cand == 0:
            return cand
    return T                                            # small / ragged: full T


def _compiler_params():
    return pltpu.CompilerParams(
        dimension_semantics=("parallel", "parallel"),
        vmem_limit_bytes=VMEM_LIMIT)


def _ln(x, w, b):
    mean = jnp.mean(x, axis=-1, keepdims=True)
    var = jnp.mean((x - mean) ** 2, axis=-1, keepdims=True)   # biased, like torch
    return (x - mean) * jax.lax.rsqrt(var + LN_EPS) * w + b


# --------------------------------------------------------------------------
# Pallas kernels
# --------------------------------------------------------------------------
def _attn_kernel(xq_ref, kv_ref, pad_ref, lnw_ref, lnb_ref,
                 wq_ref, bq_ref, wk_ref, bk_ref, wv_ref, bv_ref,
                 wo_ref, bo_ref, o_ref, *, n_head, causal, norm_kv, tile_t):
    """Fused pre-norm LayerNorm + multi-head attention + residual add."""
    xq = xq_ref[0]                          # (Tq, D) f32: pre-norm input == residual
    kv = kv_ref[0]                          # (S, D)  f32: key/value source (full seq)
    key_pad = pad_ref[0]                    # (1, S)  int32, 1 == masked key

    Tq, D = xq.shape
    S = kv.shape[0]
    H = n_head
    dh = D // H

    # fused LayerNorm (was a standalone pallas_call)
    qn = _ln(xq, lnw_ref[...], lnb_ref[...])
    kvn = _ln(kv, lnw_ref[...], lnb_ref[...]) if norm_kv else kv

    # head-batched projections: bf16 MXU inputs, f32 accumulation
    qb = jnp.broadcast_to(qn.astype(jnp.bfloat16)[None], (H, Tq, D))
    kb = jnp.broadcast_to(kvn.astype(jnp.bfloat16)[None], (H, S, D))

    q3 = jnp.einsum('hqd,hdk->hqk', qb, wq_ref[...],
                    preferred_element_type=jnp.float32) + bq_ref[...]   # (H,Tq,dh)
    k3 = jnp.einsum('hsd,hdk->hsk', kb, wk_ref[...],
                    preferred_element_type=jnp.float32) + bk_ref[...]   # (H,S,dh)
    v3 = jnp.einsum('hsd,hdk->hsk', kb, wv_ref[...],
                    preferred_element_type=jnp.float32) + bv_ref[...]   # (H,S,dh)

    q3 = q3 * (1.0 / math.sqrt(dh))         # scale once, right after the Q projection

    # (H, Tq, S) scores; mask is built in-kernel (no (B,T,S) HBM mask traffic)
    scores = jnp.einsum('hqd,hkd->hqk', q3.astype(jnp.bfloat16),
                        k3.astype(jnp.bfloat16),
                        preferred_element_type=jnp.float32)

    masked = jnp.broadcast_to(key_pad > 0, (Tq, S))
    if causal:
        q0 = pl.program_id(1) * tile_t
        row = jax.lax.broadcasted_iota(jnp.int32, (Tq, S), 0) + q0
        col = jax.lax.broadcasted_iota(jnp.int32, (Tq, S), 1)
        masked = jnp.logical_or(masked, col > row)
    scores = jnp.where(masked[None], NEG_INF, scores)

    # softmax in f32.
    # NOTE: fully-masked (padded) query rows become a uniform distribution here
    # instead of NaN like torch softmax(-inf); those rows are padding anyway.
    m = jnp.max(scores, axis=-1, keepdims=True)
    e = jnp.exp(scores - m)
    p = e * pl.reciprocal(jnp.sum(e, axis=-1, keepdims=True), approx=True)

    ctx = jnp.einsum('hqk,hkd->hqd', p.astype(jnp.bfloat16),
                     v3.astype(jnp.bfloat16),
                     preferred_element_type=jnp.float32)                # (H,Tq,dh)

    # output projection:  sum_h ctx_h @ Wo_h  ==  concat_h(ctx_h) @ Wo
    out_h = jnp.einsum('hqd,hdm->hqm', ctx.astype(jnp.bfloat16), wo_ref[...],
                       preferred_element_type=jnp.float32)              # (H,Tq,D)
    out = jnp.sum(out_h, axis=0) + bo_ref[...]

    o_ref[0] = (out + xq).astype(o_ref.dtype)                           # residual


def _ffn_kernel(x_ref, lnw_ref, lnb_ref, w1_ref, b1_ref, w2_ref, b2_ref, o_ref):
    """Fused pre-norm LayerNorm + position-wise FFN (ReLU) + residual add."""
    x = x_ref[0]                                              # (Tq, D) f32
    xn = _ln(x, lnw_ref[...], lnb_ref[...])
    hid = jnp.dot(xn.astype(jnp.bfloat16), w1_ref[...],
                  preferred_element_type=jnp.float32) + b1_ref[...]
    hid = jnp.maximum(hid, 0.0)
    out = jnp.dot(hid.astype(jnp.bfloat16), w2_ref[...],
                  preferred_element_type=jnp.float32) + b2_ref[...]
    o_ref[0] = (out + x).astype(o_ref.dtype)


def _ln_kernel(x_ref, w_ref, b_ref, o_ref):
    o_ref[0] = _ln(x_ref[0], w_ref[...], b_ref[...]).astype(o_ref.dtype)


# --------------------------------------------------------------------------
# Pallas wrappers
# --------------------------------------------------------------------------
def fused_attention(x_q, x_kv, key_pad, ln_w, ln_b, p, n_head, *,
                    causal, norm_kv, alias_residual):
    B, T, D = x_q.shape
    S = x_kv.shape[1]
    dh = D // n_head
    tile_t = _pick_tile_t(T)
    kernel = functools.partial(_attn_kernel, n_head=n_head, causal=causal,
                               norm_kv=norm_kv, tile_t=tile_t)
    extra = {"input_output_aliases": {0: 0}} if alias_residual else {}
    return pl.pallas_call(
        kernel,
        out_shape=jax.ShapeDtypeStruct((B, T, D), x_q.dtype),
        grid=(B, T // tile_t),
        in_specs=[
            pl.BlockSpec((1, tile_t, D), lambda b, q: (b, q, 0)),      # query tile / residual
            pl.BlockSpec((1, S, D), lambda b, q: (b, 0, 0)),           # full K/V source
            pl.BlockSpec((1, 1, S), lambda b, q: (b, 0, 0)),           # key-pad vector
            pl.BlockSpec((1, D), lambda b, q: (0, 0)),                 # ln_w
            pl.BlockSpec((1, D), lambda b, q: (0, 0)),                 # ln_b
            pl.BlockSpec((n_head, D, dh), lambda b, q: (0, 0, 0)),     # wq (bf16)
            pl.BlockSpec((n_head, 1, dh), lambda b, q: (0, 0, 0)),     # bq
            pl.BlockSpec((n_head, D, dh), lambda b, q: (0, 0, 0)),     # wk (bf16)
            pl.BlockSpec((n_head, 1, dh), lambda b, q: (0, 0, 0)),     # bk
            pl.BlockSpec((n_head, D, dh), lambda b, q: (0, 0, 0)),     # wv (bf16)
            pl.BlockSpec((n_head, 1, dh), lambda b, q: (0, 0, 0)),     # bv
            pl.BlockSpec((n_head, dh, D), lambda b, q: (0, 0, 0)),     # wo (bf16)
            pl.BlockSpec((1, D), lambda b, q: (0, 0)),                 # bo
        ],
        out_specs=pl.BlockSpec((1, tile_t, D), lambda b, q: (b, q, 0)),
        compiler_params=_compiler_params(),
        **extra,
    )(x_q, x_kv, key_pad, ln_w, ln_b,
      p["wq"], p["bq"], p["wk"], p["bk"], p["wv"], p["bv"], p["wo"], p["bo"])


def position_wise_ffn(x, p):
    B, T, D = x.shape
    Dh = p["w1"].shape[1]
    tile_t = _pick_tile_t(T)
    return pl.pallas_call(
        _ffn_kernel,
        out_shape=jax.ShapeDtypeStruct((B, T, D), x.dtype),
        grid=(B, T // tile_t),
        in_specs=[
            pl.BlockSpec((1, tile_t, D), lambda b, t: (b, t, 0)),
            pl.BlockSpec((1, D), lambda b, t: (0, 0)),
            pl.BlockSpec((1, D), lambda b, t: (0, 0)),
            pl.BlockSpec((D, Dh), lambda b, t: (0, 0)),
            pl.BlockSpec((1, Dh), lambda b, t: (0, 0)),
            pl.BlockSpec((Dh, D), lambda b, t: (0, 0)),
            pl.BlockSpec((1, D), lambda b, t: (0, 0)),
        ],
        out_specs=pl.BlockSpec((1, tile_t, D), lambda b, t: (b, t, 0)),
        compiler_params=_compiler_params(),
        input_output_aliases={0: 0},
    )(x, p["ln_w"], p["ln_b"], p["w1"], p["b1"], p["w2"], p["b2"])


def layer_norm(x, w, b):
    B, T, D = x.shape
    tile_t = _pick_tile_t(T)
    return pl.pallas_call(
        _ln_kernel,
        out_shape=jax.ShapeDtypeStruct((B, T, D), x.dtype),
        grid=(B, T // tile_t),
        in_specs=[
            pl.BlockSpec((1, tile_t, D), lambda b, t: (b, t, 0)),
            pl.BlockSpec((1, D), lambda b, t: (0, 0)),
            pl.BlockSpec((1, D), lambda b, t: (0, 0)),
        ],
        out_specs=pl.BlockSpec((1, tile_t, D), lambda b, t: (b, t, 0)),
        compiler_params=_compiler_params(),
        input_output_aliases={0: 0},
    )(x, w, b)


# --------------------------------------------------------------------------
# Glue: embeddings + decoder forward (plain JAX outside the kernels)
# --------------------------------------------------------------------------
def sinusoidal_pos_encoding(T, D):
    pos = jnp.arange(T, dtype=jnp.float32)[:, None]
    div = jnp.exp(jnp.arange(0, D, 2, dtype=jnp.float32) * (-math.log(10000.0) / D))
    pe = jnp.zeros((T, D), jnp.float32)
    pe = pe.at[:, 0::2].set(jnp.sin(pos * div))
    pe = pe.at[:, 1::2].set(jnp.cos(pos * div))
    return pe


def embed(tgt_seq, emb_table, d_model):
    emb = emb_table[tgt_seq]                        # gather (glue)
    emb = emb * math.sqrt(d_model)
    emb = emb + sinusoidal_pos_encoding(tgt_seq.shape[1], d_model)[None]
    return emb


def decoder_forward(params, tgt_seq, enc_output, enc_mask, n_head):
    d_model = params["emb"].shape[1]
    B, T = tgt_seq.shape
    S = enc_output.shape[1]

    emb = embed(tgt_seq, params["emb"], d_model)

    # compact key-pad vectors; the 2-D masks are built inside the kernels.
    tgt_key_pad = (tgt_seq == PAD).astype(jnp.int32).reshape(B, 1, T)
    enc_key_pad = enc_mask.astype(jnp.int32).reshape(B, 1, S)

    output = emb
    for lp in params["layers"]:
        # fused LN1 + (causal + pad masked) self-attention + residual
        output = fused_attention(output, output, tgt_key_pad,
                                 lp["ln1_w"], lp["ln1_b"], lp["slf"], n_head,
                                 causal=True, norm_kv=True, alias_residual=False)
        # fused LN2 + encoder-decoder cross-attention + residual
        output = fused_attention(output, enc_output, enc_key_pad,
                                 lp["ln2_w"], lp["ln2_b"], lp["ctx"], n_head,
                                 causal=False, norm_kv=False, alias_residual=True)
        # fused LN + position-wise FFN + residual
        output = position_wise_ffn(output, lp["ffn"])

    return layer_norm(output, params["out_ln_w"], params["out_ln_b"])


# --------------------------------------------------------------------------
# Deterministic parameter init (weights stored bf16 / head-major for the MXU)
# --------------------------------------------------------------------------
def init_linear(key, fan_in, fan_out):
    kw, kb = jax.random.split(key)
    w = jax.random.normal(kw, (fan_in, fan_out), jnp.float32) / math.sqrt(fan_in)
    b = 0.01 * jax.random.normal(kb, (1, fan_out), jnp.float32)
    return w, b


def init_attn(key, d_model, n_head):
    dh = d_model // n_head
    ks = jax.random.split(key, 4)
    wq, bq = init_linear(ks[0], d_model, d_model)
    wk, bk = init_linear(ks[1], d_model, d_model)
    wv, bv = init_linear(ks[2], d_model, d_model)
    wo, bo = init_linear(ks[3], d_model, d_model)

    def head_in(w):   # (D, D) -> (H, D, dh), head-major, bf16
        return w.reshape(d_model, n_head, dh).transpose(1, 0, 2).astype(jnp.bfloat16)

    def head_bias(b):  # (1, D) -> (H, 1, dh), f32
        return b.reshape(n_head, 1, dh)

    return dict(
        wq=head_in(wq), bq=head_bias(bq),
        wk=head_in(wk), bk=head_bias(bk),
        wv=head_in(wv), bv=head_bias(bv),
        wo=wo.reshape(n_head, dh, d_model).astype(jnp.bfloat16),   # (H, dh, D)
        bo=bo,                                                     # (1, D) f32
    )


def init_params(key, n_vocab, n_layers, n_head, d_model, d_inner):
    keys = jax.random.split(key, n_layers + 1)
    emb = 0.1 * jax.random.normal(keys[0], (n_vocab, d_model), jnp.float32)
    emb = emb.at[PAD].set(0.0)  # padding_idx row is zero

    layers = []
    for li in range(n_layers):
        k_slf, k_ctx, k_ffn = jax.random.split(keys[li + 1], 3)
        w1, b1 = init_linear(k_ffn, d_model, d_inner)
        w2, b2 = init_linear(jax.random.fold_in(k_ffn, 1), d_inner, d_model)
        layers.append(dict(
            ln1_w=jnp.ones((1, d_model), jnp.float32),
            ln1_b=jnp.zeros((1, d_model), jnp.float32),
            ln2_w=jnp.ones((1, d_model), jnp.float32),
            ln2_b=jnp.zeros((1, d_model), jnp.float32),
            slf=init_attn(k_slf, d_model, n_head),
            ctx=init_attn(k_ctx, d_model, n_head),
            ffn=dict(
                ln_w=jnp.ones((1, d_model), jnp.float32),
                ln_b=jnp.zeros((1, d_model), jnp.float32),
                w1=w1.astype(jnp.bfloat16), b1=b1,
                w2=w2.astype(jnp.bfloat16), b2=b2),
        ))
    return dict(
        emb=emb,
        layers=layers,
        out_ln_w=jnp.ones((1, d_model), jnp.float32),
        out_ln_b=jnp.zeros((1, d_model), jnp.float32),
    )


# --------------------------------------------------------------------------
if __name__ == "__main__":
    # small config consistent with the module's constructor
    n_vocab, n_layers, n_head = 50, 2, 4
    d_model, d_inner = 32, 64
    B, T, S = 2, 8, 8

    key = jax.random.PRNGKey(0)
    k_p, k_tgt, k_enc = jax.random.split(key, 3)

    params = init_params(k_p, n_vocab, n_layers, n_head, d_model, d_inner)

    tgt_seq = jax.random.randint(k_tgt, (B, T), 1, n_vocab, dtype=jnp.int32)
    tgt_seq = tgt_seq.at[1, -2:].set(PAD)                       # some padding
    enc_output = jax.random.normal(k_enc, (B, S, d_model), jnp.float32)
    enc_mask = jnp.zeros((B, S), jnp.int32).at[1, -1].set(1)    # 1 == masked src pos

    fwd = jax.jit(functools.partial(decoder_forward, n_head=n_head))
    out = fwd(params, tgt_seq, enc_output, enc_mask)
    out = jax.block_until_ready(out)

    assert out.shape == (B, T, d_model)
    assert bool(jnp.all(jnp.isfinite(out)))
    print("KERNEL_OK")
</pallas_src>

<mosaic_0001>
module attributes {stable_mosaic.version = 11 : i64} {
  func.func @_attn_kernel(%arg0: i32, %arg1: i32, %arg2: memref<1x8x32xf32, #tpu.memory_space<vmem>>, %arg3: memref<1x8x32xf32, #tpu.memory_space<vmem>>, %arg4: memref<1x1x8xi32, #tpu.memory_space<vmem>>, %arg5: memref<1x32xf32, #tpu.memory_space<vmem>>, %arg6: memref<1x32xf32, #tpu.memory_space<vmem>>, %arg7: memref<4x32x8xbf16, #tpu.memory_space<vmem>>, %arg8: memref<4x1x8xf32, #tpu.memory_space<vmem>>, %arg9: memref<4x32x8xbf16, #tpu.memory_space<vmem>>, %arg10: memref<4x1x8xf32, #tpu.memory_space<vmem>>, %arg11: memref<4x32x8xbf16, #tpu.memory_space<vmem>>, %arg12: memref<4x1x8xf32, #tpu.memory_space<vmem>>, %arg13: memref<4x8x32xbf16, #tpu.memory_space<vmem>>, %arg14: memref<1x32xf32, #tpu.memory_space<vmem>>, %arg15: memref<1x8x32xf32, #tpu.memory_space<vmem>>) attributes {dimension_semantics = [#tpu.dimension_semantics<parallel>, #tpu.dimension_semantics<parallel>], iteration_bounds = array<i64: 2, 1>, scalar_prefetch = 0 : i64, scratch_operands = 0 : i64, tpu.core_type = #tpu.core_type<tc>, window_params = [{transform_indices = @transform_0, window_bounds = array<i64: 1, 8, 32>}, {transform_indices = @transform_1, window_bounds = array<i64: 1, 8, 32>}, {transform_indices = @transform_2, window_bounds = array<i64: 1, 1, 8>}, {pipeline_mode = #tpu.pipeline_mode<synchronous>, transform_indices = @transform_3, window_bounds = array<i64: 1, 32>}, {pipeline_mode = #tpu.pipeline_mode<synchronous>, transform_indices = @transform_4, window_bounds = array<i64: 1, 32>}, {pipeline_mode = #tpu.pipeline_mode<synchronous>, transform_indices = @transform_5, window_bounds = array<i64: 4, 32, 8>}, {pipeline_mode = #tpu.pipeline_mode<synchronous>, transform_indices = @transform_6, window_bounds = array<i64: 4, 1, 8>}, {pipeline_mode = #tpu.pipeline_mode<synchronous>, transform_indices = @transform_7, window_bounds = array<i64: 4, 32, 8>}, {pipeline_mode = #tpu.pipeline_mode<synchronous>, transform_indices = @transform_8, window_bounds = array<i64: 4, 1, 8>}, {pipeline_mode = #tpu.pipeline_mode<synchronous>, transform_indices = @transform_9, window_bounds = array<i64: 4, 32, 8>}, {pipeline_mode = #tpu.pipeline_mode<synchronous>, transform_indices = @transform_10, window_bounds = array<i64: 4, 1, 8>}, {pipeline_mode = #tpu.pipeline_mode<synchronous>, transform_indices = @transform_11, window_bounds = array<i64: 4, 8, 32>}, {pipeline_mode = #tpu.pipeline_mode<synchronous>, transform_indices = @transform_12, window_bounds = array<i64: 1, 32>}, {transform_indices = @transform_13, window_bounds = array<i64: 1, 8, 32>}]} {
    %c0 = arith.constant 0 : index
    %c0_0 = arith.constant 0 : index
    %c0_1 = arith.constant 0 : index
    %0 = vector.load %arg2[%c0, %c0_0, %c0_1] : memref<1x8x32xf32, #tpu.memory_space<vmem>>, vector<1x8x32xf32>
    %1 = vector.shape_cast %0 : vector<1x8x32xf32> to vector<8x32xf32>
    %c0_2 = arith.constant 0 : index
    %c0_3 = arith.constant 0 : index
    %c0_4 = arith.constant 0 : index
    %2 = vector.load %arg3[%c0_2, %c0_3, %c0_4] : memref<1x8x32xf32, #tpu.memory_space<vmem>>, vector<1x8x32xf32>
    %3 = vector.shape_cast %2 : vector<1x8x32xf32> to vector<8x32xf32>
    %c0_5 = arith.constant 0 : index
    %c0_6 = arith.constant 0 : index
    %c0_7 = arith.constant 0 : index
    %4 = vector.load %arg4[%c0_5, %c0_6, %c0_7] : memref<1x1x8xi32, #tpu.memory_space<vmem>>, vector<1x1x8xi32>
    %5 = vector.shape_cast %4 : vector<1x1x8xi32> to vector<1x8xi32>
    %c0_8 = arith.constant 0 : index
    %c0_9 = arith.constant 0 : index
    %6 = vector.load %arg5[%c0_8, %c0_9] : memref<1x32xf32, #tpu.memory_space<vmem>>, vector<1x32xf32>
    %c0_10 = arith.constant 0 : index
    %c0_11 = arith.constant 0 : index
    %7 = vector.load %arg6[%c0_10, %c0_11] : memref<1x32xf32, #tpu.memory_space<vmem>>, vector<1x32xf32>
    %cst = arith.constant dense<0.000000e+00> : vector<8xf32>
    %8 = vector.multi_reduction <add>, %1, %cst [1] : vector<8x32xf32> to vector<8xf32>
    %9 = vector.shape_cast %8 : vector<8xf32> to vector<8x1xf32>
    %cst_12 = arith.constant 3.200000e+01 : f32
    %10 = vector.broadcast %cst_12 : f32 to vector<8x1xf32>
    %11 = arith.divf %9, %10 : vector<8x1xf32>
    %12 = vector.broadcast %11 : vector<8x1xf32> to vector<8x32xf32>
    %13 = arith.subf %1, %12 : vector<8x32xf32>
    %14 = arith.mulf %13, %13 : vector<8x32xf32>
    %cst_13 = arith.constant dense<0.000000e+00> : vector<8xf32>
    %15 = vector.multi_reduction <add>, %14, %cst_13 [1] : vector<8x32xf32> to vector<8xf32>
    %16 = vector.shape_cast %15 : vector<8xf32> to vector<8x1xf32>
    %cst_14 = arith.constant 3.200000e+01 : f32
    %17 = vector.broadcast %cst_14 : f32 to vector<8x1xf32>
    %18 = arith.divf %16, %17 : vector<8x1xf32>
    %19 = vector.broadcast %11 : vector<8x1xf32> to vector<8x32xf32>
    %20 = arith.subf %1, %19 : vector<8x32xf32>
    %cst_15 = arith.constant 9.99999974E-6 : f32
    %21 = vector.broadcast %cst_15 : f32 to vector<8x1xf32>
    %22 = arith.addf %18, %21 : vector<8x1xf32>
    %23 = math.rsqrt %22 : vector<8x1xf32>
    %24 = vector.broadcast %23 : vector<8x1xf32> to vector<8x32xf32>
    %25 = arith.mulf %20, %24 : vector<8x32xf32>
    %26 = vector.broadcast %6 : vector<1x32xf32> to vector<8x32xf32>
    %27 = arith.mulf %25, %26 : vector<8x32xf32>
    %28 = vector.broadcast %7 : vector<1x32xf32> to vector<8x32xf32>
    %29 = arith.addf %27, %28 : vector<8x32xf32>
    %30 = arith.truncf %29 : vector<8x32xf32> to vector<8x32xbf16>
    %31 = vector.shape_cast %30 : vector<8x32xbf16> to vector<1x8x32xbf16>
    %32 = vector.shape_cast %31 : vector<1x8x32xbf16> to vector<1x8x32xbf16>
    %33 = vector.broadcast %32 : vector<1x8x32xbf16> to vector<4x8x32xbf16>
    %34 = arith.truncf %3 : vector<8x32xf32> to vector<8x32xbf16>
    %35 = vector.shape_cast %34 : vector<8x32xbf16> to vector<1x8x32xbf16>
    %36 = vector.shape_cast %35 : vector<1x8x32xbf16> to vector<1x8x32xbf16>
    %37 = vector.broadcast %36 : vector<1x8x32xbf16> to vector<4x8x32xbf16>
    %c0_16 = arith.constant 0 : index
    %c0_17 = arith.constant 0 : index
    %c0_18 = arith.constant 0 : index
    %38 = vector.load %arg7[%c0_16, %c0_17, %c0_18] : memref<4x32x8xbf16, #tpu.memory_space<vmem>>, vector<4x32x8xbf16>
    "tpu.trace_start"() <{level = 10 : i32, message = "hqd,hdk->hqk"}> : () -> ()
    %cst_19 = arith.constant dense<0.000000e+00> : vector<4x8x8xf32>
    %39 = tpu.matmul %33, %38, %cst_19 {dimension_numbers = #tpu.dot_dimension_numbers<[2], [1], [1], [2], [0, 0, 0, 1, 1, 2], [0], [0]>} : vector<4x8x32xbf16>, vector<4x32x8xbf16>, vector<4x8x8xf32> -> vector<4x8x8xf32>
    "tpu.trace_stop"() : () -> ()
    %c0_20 = arith.constant 0 : index
    %c0_21 = arith.constant 0 : index
    %c0_22 = arith.constant 0 : index
    %40 = vector.load %arg8[%c0_20, %c0_21, %c0_22] : memref<4x1x8xf32, #tpu.memory_space<vmem>>, vector<4x1x8xf32>
    %41 = vector.broadcast %40 : vector<4x1x8xf32> to vector<4x8x8xf32>
    %42 = arith.addf %39, %41 : vector<4x8x8xf32>
    %c0_23 = arith.constant 0 : index
    %c0_24 = arith.constant 0 : index
    %c0_25 = arith.constant 0 : index
    %43 = vector.load %arg9[%c0_23, %c0_24, %c0_25] : memref<4x32x8xbf16, #tpu.memory_space<vmem>>, vector<4x32x8xbf16>
    "tpu.trace_start"() <{level = 10 : i32, message = "hsd,hdk->hsk"}> : () -> ()
    %cst_26 = arith.constant dense<0.000000e+00> : vector<4x8x8xf32>
    %44 = tpu.matmul %37, %43, %cst_26 {dimension_numbers = #tpu.dot_dimension_numbers<[2], [1], [1], [2], [0, 0, 0, 1, 1, 2], [0], [0]>} : vector<4x8x32xbf16>, vector<4x32x8xbf16>, vector<4x8x8xf32> -> vector<4x8x8xf32>
    "tpu.trace_stop"() : () -> ()
    %c0_27 = arith.constant 0 : index
    %c0_28 = arith.constant 0 : index
    %c0_29 = arith.constant 0 : index
    %45 = vector.load %arg10[%c0_27, %c0_28, %c0_29] : memref<4x1x8xf32, #tpu.memory_space<vmem>>, vector<4x1x8xf32>
    %46 = vector.broadcast %45 : vector<4x1x8xf32> to vector<4x8x8xf32>
    %47 = arith.addf %44, %46 : vector<4x8x8xf32>
    %c0_30 = arith.constant 0 : index
    %c0_31 = arith.constant 0 : index
    %c0_32 = arith.constant 0 : index
    %48 = vector.load %arg11[%c0_30, %c0_31, %c0_32] : memref<4x32x8xbf16, #tpu.memory_space<vmem>>, vector<4x32x8xbf16>
    "tpu.trace_start"() <{level = 10 : i32, message = "hsd,hdk->hsk"}> : () -> ()
    %cst_33 = arith.constant dense<0.000000e+00> : vector<4x8x8xf32>
    %49 = tpu.matmul %37, %48, %cst_33 {dimension_numbers = #tpu.dot_dimension_numbers<[2], [1], [1], [2], [0, 0, 0, 1, 1, 2], [0], [0]>} : vector<4x8x32xbf16>, vector<4x32x8xbf16>, vector<4x8x8xf32> -> vector<4x8x8xf32>
    "tpu.trace_stop"() : () -> ()
    %c0_34 = arith.constant 0 : index
    %c0_35 = arith.constant 0 : index
    %c0_36 = arith.constant 0 : index
    %50 = vector.load %arg12[%c0_34, %c0_35, %c0_36] : memref<4x1x8xf32, #tpu.memory_space<vmem>>, vector<4x1x8xf32>
    %51 = vector.broadcast %50 : vector<4x1x8xf32> to vector<4x8x8xf32>
    %52 = arith.addf %49, %51 : vector<4x8x8xf32>
    %cst_37 = arith.constant 0.353553385 : f32
    %53 = vector.broadcast %cst_37 : f32 to vector<4x8x8xf32>
    %54 = arith.mulf %42, %53 : vector<4x8x8xf32>
    %55 = arith.truncf %54 : vector<4x8x8xf32> to vector<4x8x8xbf16>
    %56 = arith.truncf %47 : vector<4x8x8xf32> to vector<4x8x8xbf16>
    "tpu.trace_start"() <{level = 10 : i32, message = "hqd,hkd->hqk"}> : () -> ()
    %cst_38 = arith.constant dense<0.000000e+00> : vector<4x8x8xf32>
    %57 = tpu.matmul %55, %56, %cst_38 {dimension_numbers = #tpu.dot_dimension_numbers<[2], [2], [1], [1], [0, 0, 0, 1, 1, 1], [0], [0]>} : vector<4x8x8xbf16>, vector<4x8x8xbf16>, vector<4x8x8xf32> -> vector<4x8x8xf32>
    %c0_i32 = arith.constant 0 : i32
    "tpu.trace_stop"() : () -> ()
    %58 = vector.broadcast %c0_i32 : i32 to vector<1x8xi32>
    %59 = arith.cmpi sgt, %5, %58 : vector<1x8xi32>
    %60 = vector.shape_cast %59 : vector<1x8xi1> to vector<1x8xi1>
    %61 = vector.broadcast %60 : vector<1x8xi1> to vector<8x8xi1>
    %62 = vector.shape_cast %61 : vector<8x8xi1> to vector<1x8x8xi1>
    %cst_39 = arith.constant -9.99999984E+17 : f32
    %63 = vector.shape_cast %62 : vector<1x8x8xi1> to vector<1x8x8xi1>
    %64 = vector.broadcast %63 : vector<1x8x8xi1> to vector<4x8x8xi1>
    %65 = vector.broadcast %cst_39 : f32 to vector<4x8x8xf32>
    %66 = arith.select %64, %65, %57 : vector<4x8x8xi1>, vector<4x8x8xf32>
    %cst_40 = arith.constant dense<0xFF800000> : vector<4x8xf32>
    %67 = vector.multi_reduction <maximumf>, %66, %cst_40 [2] : vector<4x8x8xf32> to vector<4x8xf32>
    %68 = vector.shape_cast %67 : vector<4x8xf32> to vector<4x8x1xf32>
    %69 = vector.broadcast %68 : vector<4x8x1xf32> to vector<4x8x8xf32>
    %70 = arith.subf %66, %69 : vector<4x8x8xf32>
    %71 = math.exp %70 : vector<4x8x8xf32>
    %cst_41 = arith.constant dense<0.000000e+00> : vector<4x8xf32>
    %72 = vector.multi_reduction <add>, %71, %cst_41 [2] : vector<4x8x8xf32> to vector<4x8xf32>
    %73 = vector.shape_cast %72 : vector<4x8xf32> to vector<4x8x1xf32>
    %74 = tpu.reciprocal %73 {approx = true} : vector<4x8x1xf32> -> vector<4x8x1xf32>
    %75 = vector.broadcast %74 : vector<4x8x1xf32> to vector<4x8x8xf32>
    %76 = arith.mulf %71, %75 : vector<4x8x8xf32>
    %77 = arith.truncf %76 : vector<4x8x8xf32> to vector<4x8x8xbf16>
    %78 = arith.truncf %52 : vector<4x8x8xf32> to vector<4x8x8xbf16>
    "tpu.trace_start"() <{level = 10 : i32, message = "hqk,hkd->hqd"}> : () -> ()
    %cst_42 = arith.constant dense<0.000000e+00> : vector<4x8x8xf32>
    %79 = tpu.matmul %77, %78, %cst_42 {dimension_numbers = #tpu.dot_dimension_numbers<[2], [1], [1], [2], [0, 0, 0, 1, 1, 2], [0], [0]>} : vector<4x8x8xbf16>, vector<4x8x8xbf16>, vector<4x8x8xf32> -> vector<4x8x8xf32>
    "tpu.trace_stop"() : () -> ()
    %80 = arith.truncf %79 : vector<4x8x8xf32> to vector<4x8x8xbf16>
    %c0_43 = arith.constant 0 : index
    %c0_44 = arith.constant 0 : index
    %c0_45 = arith.constant 0 : index
    %81 = vector.load %arg13[%c0_43, %c0_44, %c0_45] : memref<4x8x32xbf16, #tpu.memory_space<vmem>>, vector<4x8x32xbf16>
    "tpu.trace_start"() <{level = 10 : i32, message = "hqd,hdm->hqm"}> : () -> ()
    %cst_46 = arith.constant dense<0.000000e+00> : vector<4x8x32xf32>
    %82 = tpu.matmul %80, %81, %cst_46 {dimension_numbers = #tpu.dot_dimension_numbers<[2], [1], [1], [2], [0, 0, 0, 1, 1, 2], [0], [0]>} : vector<4x8x8xbf16>, vector<4x8x32xbf16>, vector<4x8x32xf32> -> vector<4x8x32xf32>
    "tpu.trace_stop"() : () -> ()
    %cst_47 = arith.constant dense<0.000000e+00> : vector<8x32xf32>
    %83 = vector.multi_reduction <add>, %82, %cst_47 [0] : vector<4x8x32xf32> to vector<8x32xf32>
    %c0_48 = arith.constant 0 : index
    %c0_49 = arith.constant 0 : index
    %84 = vector.load %arg14[%c0_48, %c0_49] : memref<1x32xf32, #tpu.memory_space<vmem>>, vector<1x32xf32>
    %85 = vector.broadcast %84 : vector<1x32xf32> to vector<8x32xf32>
    %86 = arith.addf %83, %85 : vector<8x32xf32>
    %87 = arith.addf %86, %1 : vector<8x32xf32>
    %c0_50 = arith.constant 0 : index
    %c0_51 = arith.constant 0 : index
    %c0_52 = arith.constant 0 : index
    %88 = vector.load %arg15[%c0_50, %c0_51, %c0_52] : memref<1x8x32xf32, #tpu.memory_space<vmem>>, vector<1x8x32xf32>
    %89 = vector.shape_cast %88 : vector<1x8x32xf32> to vector<8x32xf32>
    %90 = vector.shape_cast %87 : vector<8x32xf32> to vector<1x8x32xf32>
    tpu.vector_store %arg15[%c0_50, %c0_51, %c0_52], %90 {strides = array<i32>} : memref<1x8x32xf32, #tpu.memory_space<vmem>>, vector<1x8x32xf32>,
    return
  }
  func.func @transform_0(%arg0: i32, %arg1: i32) -> (i32, i32, i32) {
    %c0_i32 = arith.constant 0 : i32
    %c0_i32_0 = arith.constant 0 : i32
    return %arg0, %arg1, %c0_i32 : i32, i32, i32
  }
  func.func @transform_1(%arg0: i32, %arg1: i32) -> (i32, i32, i32) {
    %c0_i32 = arith.constant 0 : i32
    %c0_i32_0 = arith.constant 0 : i32
    %c0_i32_1 = arith.constant 0 : i32
    return %arg0, %c0_i32, %c0_i32_0 : i32, i32, i32
  }
  func.func @transform_2(%arg0: i32, %arg1: i32) -> (i32, i32, i32) {
    %c0_i32 = arith.constant 0 : i32
    %c0_i32_0 = arith.constant 0 : i32
    %c0_i32_1 = arith.constant 0 : i32
    return %arg0, %c0_i32, %c0_i32_0 : i32, i32, i32
  }
  func.func @transform_3(%arg0: i32, %arg1: i32) -> (i32, i32) {
    %c0_i32 = arith.constant 0 : i32
    %c0_i32_0 = arith.constant 0 : i32
    %c0_i32_1 = arith.constant 0 : i32
    return %c0_i32, %c0_i32_0 : i32, i32
  }
  func.func @transform_4(%arg0: i32, %arg1: i32) -> (i32, i32) {
    %c0_i32 = arith.constant 0 : i32
    %c0_i32_0 = arith.constant 0 : i32
    %c0_i32_1 = arith.constant 0 : i32
    return %c0_i32, %c0_i32_0 : i32, i32
  }
  func.func @transform_5(%arg0: i32, %arg1: i32) -> (i32, i32, i32) {
    %c0_i32 = arith.constant 0 : i32
    %c0_i32_0 = arith.constant 0 : i32
    %c0_i32_1 = arith.constant 0 : i32
    %c0_i32_2 = arith.constant 0 : i32
    return %c0_i32, %c0_i32_0, %c0_i32_1 : i32, i32, i32
  }
  func.func @transform_6(%arg0: i32, %arg1: i32) -> (i32, i32, i32) {
    %c0_i32 = arith.constant 0 : i32
    %c0_i32_0 = arith.constant 0 : i32
    %c0_i32_1 = arith.constant 0 : i32
    %c0_i32_2 = arith.constant 0 : i32
    return %c0_i32, %c0_i32_0, %c0_i32_1 : i32, i32, i32
  }
  func.func @transform_7(%arg0: i32, %arg1: i32) -> (i32, i32, i32) {
    %c0_i32 = arith.constant 0 : i32
    %c0_i32_0 = arith.constant 0 : i32
    %c0_i32_1 = arith.constant 0 : i32
    %c0_i32_2 = arith.constant 0 : i32
    return %c0_i32, %c0_i32_0, %c0_i32_1 : i32, i32, i32
  }
  func.func @transform_8(%arg0: i32, %arg1: i32) -> (i32, i32, i32) {
    %c0_i32 = arith.constant 0 : i32
    %c0_i32_0 = arith.constant 0 : i32
    %c0_i32_1 = arith.constant 0 : i32
    %c0_i32_2 = arith.constant 0 : i32
    return %c0_i32, %c0_i32_0, %c0_i32_1 : i32, i32, i32
  }
  func.func @transform_9(%arg0: i32, %arg1: i32) -> (i32, i32, i32) {
    %c0_i32 = arith.constant 0 : i32
    %c0_i32_0 = arith.constant 0 : i32
    %c0_i32_1 = arith.constant 0 : i32
    %c0_i32_2 = arith.constant 0 : i32
    return %c0_i32, %c0_i32_0, %c0_i32_1 : i32, i32, i32
  }
  func.func @transform_10(%arg0: i32, %arg1: i32) -> (i32, i32, i32) {
    %c0_i32 = arith.constant 0 : i32
    %c0_i32_0 = arith.constant 0 : i32
    %c0_i32_1 = arith.constant 0 : i32
    %c0_i32_2 = arith.constant 0 : i32
    return %c0_i32, %c0_i32_0, %c0_i32_1 : i32, i32, i32
  }
  func.func @transform_11(%arg0: i32, %arg1: i32) -> (i32, i32, i32) {
    %c0_i32 = arith.constant 0 : i32
    %c0_i32_0 = arith.constant 0 : i32
    %c0_i32_1 = arith.constant 0 : i32
    %c0_i32_2 = arith.constant 0 : i32
    return %c0_i32, %c0_i32_0, %c0_i32_1 : i32, i32, i32
  }
  func.func @transform_12(%arg0: i32, %arg1: i32) -> (i32, i32) {
    %c0_i32 = arith.constant 0 : i32
    %c0_i32_0 = arith.constant 0 : i32
    %c0_i32_1 = arith.constant 0 : i32
    return %c0_i32, %c0_i32_0 : i32, i32
  }
  func.func @transform_13(%arg0: i32, %arg1: i32) -> (i32, i32, i32) {
    %c0_i32 = arith.constant 0 : i32
    %c0_i32_0 = arith.constant 0 : i32
    return %arg0, %arg1, %c0_i32 : i32, i32, i32
  }
}

module attributes {stable_mosaic.version = 11 : i64} {
  func.func @_attn_kernel(%arg0: i32, %arg1: i32, %arg2: memref<1x8x32xf32, #tpu.memory_space<vmem>>, %arg3: memref<1x8x32xf32, #tpu.memory_space<vmem>>, %arg4: memref<1x1x8xi32, #tpu.memory_space<vmem>>, %arg5: memref<1x32xf32, #tpu.memory_space<vmem>>, %arg6: memref<1x32xf32, #tpu.memory_space<vmem>>, %arg7: memref<4x32x8xbf16, #tpu.memory_space<vmem>>, %arg8: memref<4x1x8xf32, #tpu.memory_space<vmem>>, %arg9: memref<4x32x8xbf16, #tpu.memory_space<vmem>>, %arg10: memref<4x1x8xf32, #tpu.memory_space<vmem>>, %arg11: memref<4x32x8xbf16, #tpu.memory_space<vmem>>, %arg12: memref<4x1x8xf32, #tpu.memory_space<vmem>>, %arg13: memref<4x8x32xbf16, #tpu.memory_space<vmem>>, %arg14: memref<1x32xf32, #tpu.memory_space<vmem>>, %arg15: memref<1x8x32xf32, #tpu.memory_space<vmem>>) attributes {dimension_semantics = [#tpu.dimension_semantics<parallel>, #tpu.dimension_semantics<parallel>], iteration_bounds = array<i64: 2, 1>, scalar_prefetch = 0 : i64, scratch_operands = 0 : i64, tpu.core_type = #tpu.core_type<tc>, window_params = [{transform_indices = @transform_0, window_bounds = array<i64: 1, 8, 32>}, {transform_indices = @transform_1, window_bounds = array<i64: 1, 8, 32>}, {transform_indices = @transform_2, window_bounds = array<i64: 1, 1, 8>}, {pipeline_mode = #tpu.pipeline_mode<synchronous>, transform_indices = @transform_3, window_bounds = array<i64: 1, 32>}, {pipeline_mode = #tpu.pipeline_mode<synchronous>, transform_indices = @transform_4, window_bounds = array<i64: 1, 32>}, {pipeline_mode = #tpu.pipeline_mode<synchronous>, transform_indices = @transform_5, window_bounds = array<i64: 4, 32, 8>}, {pipeline_mode = #tpu.pipeline_mode<synchronous>, transform_indices = @transform_6, window_bounds = array<i64: 4, 1, 8>}, {pipeline_mode = #tpu.pipeline_mode<synchronous>, transform_indices = @transform_7, window_bounds = array<i64: 4, 32, 8>}, {pipeline_mode = #tpu.pipeline_mode<synchronous>, transform_indices = @transform_8, window_bounds = array<i64: 4, 1, 8>}, {pipeline_mode = #tpu.pipeline_mode<synchronous>, transform_indices = @transform_9, window_bounds = array<i64: 4, 32, 8>}, {pipeline_mode = #tpu.pipeline_mode<synchronous>, transform_indices = @transform_10, window_bounds = array<i64: 4, 1, 8>}, {pipeline_mode = #tpu.pipeline_mode<synchronous>, transform_indices = @transform_11, window_bounds = array<i64: 4, 8, 32>}, {pipeline_mode = #tpu.pipeline_mode<synchronous>, transform_indices = @transform_12, window_bounds = array<i64: 1, 32>}, {transform_indices = @transform_13, window_bounds = array<i64: 1, 8, 32>}]} {
    %c0 = arith.constant 0 : index
    %c0_0 = arith.constant 0 : index
    %c0_1 = arith.constant 0 : index
    %0 = vector.load %arg2[%c0, %c0_0, %c0_1] : memref<1x8x32xf32, #tpu.memory_space<vmem>>, vector<1x8x32xf32>
    %1 = vector.shape_cast %0 : vector<1x8x32xf32> to vector<8x32xf32>
    %c0_2 = arith.constant 0 : index
    %c0_3 = arith.constant 0 : index
    %c0_4 = arith.constant 0 : index
    %2 = vector.load %arg3[%c0_2, %c0_3, %c0_4] : memref<1x8x32xf32, #tpu.memory_space<vmem>>, vector<1x8x32xf32>
    %3 = vector.shape_cast %2 : vector<1x8x32xf32> to vector<8x32xf32>
    %c0_5 = arith.constant 0 : index
    %c0_6 = arith.constant 0 : index
    %c0_7 = arith.constant 0 : index
    %4 = vector.load %arg4[%c0_5, %c0_6, %c0_7] : memref<1x1x8xi32, #tpu.memory_space<vmem>>, vector<1x1x8xi32>
    %5 = vector.shape_cast %4 : vector<1x1x8xi32> to vector<1x8xi32>
    %c0_8 = arith.constant 0 : index
    %c0_9 = arith.constant 0 : index
    %6 = vector.load %arg5[%c0_8, %c0_9] : memref<1x32xf32, #tpu.memory_space<vmem>>, vector<1x32xf32>
    %c0_10 = arith.constant 0 : index
    %c0_11 = arith.constant 0 : index
    %7 = vector.load %arg6[%c0_10, %c0_11] : memref<1x32xf32, #tpu.memory_space<vmem>>, vector<1x32xf32>
    %cst = arith.constant dense<0.000000e+00> : vector<8xf32>
    %8 = vector.multi_reduction <add>, %1, %cst [1] : vector<8x32xf32> to vector<8xf32>
    %9 = vector.shape_cast %8 : vector<8xf32> to vector<8x1xf32>
    %cst_12 = arith.constant 3.200000e+01 : f32
    %10 = vector.broadcast %cst_12 : f32 to vector<8x1xf32>
    %11 = arith.divf %9, %10 : vector<8x1xf32>
    %12 = vector.broadcast %11 : vector<8x1xf32> to vector<8x32xf32>
    %13 = arith.subf %1, %12 : vector<8x32xf32>
    %14 = arith.mulf %13, %13 : vector<8x32xf32>
    %cst_13 = arith.constant dense<0.000000e+00> : vector<8xf32>
    %15 = vector.multi_reduction <add>, %14, %cst_13 [1] : vector<8x32xf32> to vector<8xf32>
    %16 = vector.shape_cast %15 : vector<8xf32> to vector<8x1xf32>
    %cst_14 = arith.constant 3.200000e+01 : f32
    %17 = vector.broadcast %cst_14 : f32 to vector<8x1xf32>
    %18 = arith.divf %16, %17 : vector<8x1xf32>
    %19 = vector.broadcast %11 : vector<8x1xf32> to vector<8x32xf32>
    %20 = arith.subf %1, %19 : vector<8x32xf32>
    %cst_15 = arith.constant 9.99999974E-6 : f32
    %21 = vector.broadcast %cst_15 : f32 to vector<8x1xf32>
    %22 = arith.addf %18, %21 : vector<8x1xf32>
    %23 = math.rsqrt %22 : vector<8x1xf32>
    %24 = vector.broadcast %23 : vector<8x1xf32> to vector<8x32xf32>
    %25 = arith.mulf %20, %24 : vector<8x32xf32>
    %26 = vector.broadcast %6 : vector<1x32xf32> to vector<8x32xf32>
    %27 = arith.mulf %25, %26 : vector<8x32xf32>
    %28 = vector.broadcast %7 : vector<1x32xf32> to vector<8x32xf32>
    %29 = arith.addf %27, %28 : vector<8x32xf32>
    %c0_16 = arith.constant 0 : index
    %c0_17 = arith.constant 0 : index
    %30 = vector.load %arg5[%c0_16, %c0_17] : memref<1x32xf32, #tpu.memory_space<vmem>>, vector<1x32xf32>
    %c0_18 = arith.constant 0 : index
    %c0_19 = arith.constant 0 : index
    %31 = vector.load %arg6[%c0_18, %c0_19] : memref<1x32xf32, #tpu.memory_space<vmem>>, vector<1x32xf32>
    %cst_20 = arith.constant dense<0.000000e+00> : vector<8xf32>
    %32 = vector.multi_reduction <add>, %3, %cst_20 [1] : vector<8x32xf32> to vector<8xf32>
    %33 = vector.shape_cast %32 : vector<8xf32> to vector<8x1xf32>
    %cst_21 = arith.constant 3.200000e+01 : f32
    %34 = vector.broadcast %cst_21 : f32 to vector<8x1xf32>
    %35 = arith.divf %33, %34 : vector<8x1xf32>
    %36 = vector.broadcast %35 : vector<8x1xf32> to vector<8x32xf32>
    %37 = arith.subf %3, %36 : vector<8x32xf32>
    %38 = arith.mulf %37, %37 : vector<8x32xf32>
    %cst_22 = arith.constant dense<0.000000e+00> : vector<8xf32>
    %39 = vector.multi_reduction <add>, %38, %cst_22 [1] : vector<8x32xf32> to vector<8xf32>
    %40 = vector.shape_cast %39 : vector<8xf32> to vector<8x1xf32>
    %cst_23 = arith.constant 3.200000e+01 : f32
    %41 = vector.broadcast %cst_23 : f32 to vector<8x1xf32>
    %42 = arith.divf %40, %41 : vector<8x1xf32>
    %43 = vector.broadcast %35 : vector<8x1xf32> to vector<8x32xf32>
    %44 = arith.subf %3, %43 : vector<8x32xf32>
    %cst_24 = arith.constant 9.99999974E-6 : f32
    %45 = vector.broadcast %cst_24 : f32 to vector<8x1xf32>
    %46 = arith.addf %42, %45 : vector<8x1xf32>
    %47 = math.rsqrt %46 : vector<8x1xf32>
    %48 = vector.broadcast %47 : vector<8x1xf32> to vector<8x32xf32>
    %49 = arith.mulf %44, %48 : vector<8x32xf32>
    %50 = vector.broadcast %30 : vector<1x32xf32> to vector<8x32xf32>
    %51 = arith.mulf %49, %50 : vector<8x32xf32>
    %52 = vector.broadcast %31 : vector<1x32xf32> to vector<8x32xf32>
    %53 = arith.addf %51, %52 : vector<8x32xf32>
    %54 = arith.truncf %29 : vector<8x32xf32> to vector<8x32xbf16>
    %55 = vector.shape_cast %54 : vector<8x32xbf16> to vector<1x8x32xbf16>
    %56 = vector.shape_cast %55 : vector<1x8x32xbf16> to vector<1x8x32xbf16>
    %57 = vector.broadcast %56 : vector<1x8x32xbf16> to vector<4x8x32xbf16>
    %58 = arith.truncf %53 : vector<8x32xf32> to vector<8x32xbf16>
    %59 = vector.shape_cast %58 : vector<8x32xbf16> to vector<1x8x32xbf16>
    %60 = vector.shape_cast %59 : vector<1x8x32xbf16> to vector<1x8x32xbf16>
    %61 = vector.broadcast %60 : vector<1x8x32xbf16> to vector<4x8x32xbf16>
    %c0_25 = arith.constant 0 : index
    %c0_26 = arith.constant 0 : index
    %c0_27 = arith.constant 0 : index
    %62 = vector.load %arg7[%c0_25, %c0_26, %c0_27] : memref<4x32x8xbf16, #tpu.memory_space<vmem>>, vector<4x32x8xbf16>
    "tpu.trace_start"() <{level = 10 : i32, message = "hqd,hdk->hqk"}> : () -> ()
    %cst_28 = arith.constant dense<0.000000e+00> : vector<4x8x8xf32>
    %63 = tpu.matmul %57, %62, %cst_28 {dimension_numbers = #tpu.dot_dimension_numbers<[2], [1], [1], [2], [0, 0, 0, 1, 1, 2], [0], [0]>} : vector<4x8x32xbf16>, vector<4x32x8xbf16>, vector<4x8x8xf32> -> vector<4x8x8xf32>
    "tpu.trace_stop"() : () -> ()
    %c0_29 = arith.constant 0 : index
    %c0_30 = arith.constant 0 : index
    %c0_31 = arith.constant 0 : index
    %64 = vector.load %arg8[%c0_29, %c0_30, %c0_31] : memref<4x1x8xf32, #tpu.memory_space<vmem>>, vector<4x1x8xf32>
    %65 = vector.broadcast %64 : vector<4x1x8xf32> to vector<4x8x8xf32>
    %66 = arith.addf %63, %65 : vector<4x8x8xf32>
    %c0_32 = arith.constant 0 : index
    %c0_33 = arith.constant 0 : index
    %c0_34 = arith.constant 0 : index
    %67 = vector.load %arg9[%c0_32, %c0_33, %c0_34] : memref<4x32x8xbf16, #tpu.memory_space<vmem>>, vector<4x32x8xbf16>
    "tpu.trace_start"() <{level = 10 : i32, message = "hsd,hdk->hsk"}> : () -> ()
    %cst_35 = arith.constant dense<0.000000e+00> : vector<4x8x8xf32>
    %68 = tpu.matmul %61, %67, %cst_35 {dimension_numbers = #tpu.dot_dimension_numbers<[2], [1], [1], [2], [0, 0, 0, 1, 1, 2], [0], [0]>} : vector<4x8x32xbf16>, vector<4x32x8xbf16>, vector<4x8x8xf32> -> vector<4x8x8xf32>
    "tpu.trace_stop"() : () -> ()
    %c0_36 = arith.constant 0 : index
    %c0_37 = arith.constant 0 : index
    %c0_38 = arith.constant 0 : index
    %69 = vector.load %arg10[%c0_36, %c0_37, %c0_38] : memref<4x1x8xf32, #tpu.memory_space<vmem>>, vector<4x1x8xf32>
    %70 = vector.broadcast %69 : vector<4x1x8xf32> to vector<4x8x8xf32>
    %71 = arith.addf %68, %70 : vector<4x8x8xf32>
    %c0_39 = arith.constant 0 : index
    %c0_40 = arith.constant 0 : index
    %c0_41 = arith.constant 0 : index
    %72 = vector.load %arg11[%c0_39, %c0_40, %c0_41] : memref<4x32x8xbf16, #tpu.memory_space<vmem>>, vector<4x32x8xbf16>
    "tpu.trace_start"() <{level = 10 : i32, message = "hsd,hdk->hsk"}> : () -> ()
    %cst_42 = arith.constant dense<0.000000e+00> : vector<4x8x8xf32>
    %73 = tpu.matmul %61, %72, %cst_42 {dimension_numbers = #tpu.dot_dimension_numbers<[2], [1], [1], [2], [0, 0, 0, 1, 1, 2], [0], [0]>} : vector<4x8x32xbf16>, vector<4x32x8xbf16>, vector<4x8x8xf32> -> vector<4x8x8xf32>
    "tpu.trace_stop"() : () -> ()
    %c0_43 = arith.constant 0 : index
    %c0_44 = arith.constant 0 : index
    %c0_45 = arith.constant 0 : index
    %74 = vector.load %arg12[%c0_43, %c0_44, %c0_45] : memref<4x1x8xf32, #tpu.memory_space<vmem>>, vector<4x1x8xf32>
    %75 = vector.broadcast %74 : vector<4x1x8xf32> to vector<4x8x8xf32>
    %76 = arith.addf %73, %75 : vector<4x8x8xf32>
    %cst_46 = arith.constant 0.353553385 : f32
    %77 = vector.broadcast %cst_46 : f32 to vector<4x8x8xf32>
    %78 = arith.mulf %66, %77 : vector<4x8x8xf32>
    %79 = arith.truncf %78 : vector<4x8x8xf32> to vector<4x8x8xbf16>
    %80 = arith.truncf %71 : vector<4x8x8xf32> to vector<4x8x8xbf16>
    "tpu.trace_start"() <{level = 10 : i32, message = "hqd,hkd->hqk"}> : () -> ()
    %cst_47 = arith.constant dense<0.000000e+00> : vector<4x8x8xf32>
    %81 = tpu.matmul %79, %80, %cst_47 {dimension_numbers = #tpu.dot_dimension_numbers<[2], [2], [1], [1], [0, 0, 0, 1, 1, 1], [0], [0]>} : vector<4x8x8xbf16>, vector<4x8x8xbf16>, vector<4x8x8xf32> -> vector<4x8x8xf32>
    %c0_i32 = arith.constant 0 : i32
    "tpu.trace_stop"() : () -> ()
    %82 = vector.broadcast %c0_i32 : i32 to vector<1x8xi32>
    %83 = arith.cmpi sgt, %5, %82 : vector<1x8xi32>
    %84 = vector.shape_cast %83 : vector<1x8xi1> to vector<1x8xi1>
    %85 = vector.broadcast %84 : vector<1x8xi1> to vector<8x8xi1>
    %c8_i32 = arith.constant 8 : i32
    %86 = arith.muli %arg1, %c8_i32 : i32
    %87 = tpu.iota {dimensions = array<i32: 0>} : vector<8x8xi32>
    %88 = vector.broadcast %86 : i32 to vector<8x8xi32>
    %89 = arith.addi %87, %88 : vector<8x8xi32>
    %90 = tpu.iota {dimensions = array<i32: 1>} : vector<8x8xi32>
    %91 = arith.cmpi sgt, %90, %89 : vector<8x8xi32>
    %92 = arith.ori %85, %91 : vector<8x8xi1>
    %93 = vector.shape_cast %92 : vector<8x8xi1> to vector<1x8x8xi1>
    %cst_48 = arith.constant -9.99999984E+17 : f32
    %94 = vector.shape_cast %93 : vector<1x8x8xi1> to vector<1x8x8xi1>
    %95 = vector.broadcast %94 : vector<1x8x8xi1> to vector<4x8x8xi1>
    %96 = vector.broadcast %cst_48 : f32 to vector<4x8x8xf32>
    %97 = arith.select %95, %96, %81 : vector<4x8x8xi1>, vector<4x8x8xf32>
    %cst_49 = arith.constant dense<0xFF800000> : vector<4x8xf32>
    %98 = vector.multi_reduction <maximumf>, %97, %cst_49 [2] : vector<4x8x8xf32> to vector<4x8xf32>
    %99 = vector.shape_cast %98 : vector<4x8xf32> to vector<4x8x1xf32>
    %100 = vector.broadcast %99 : vector<4x8x1xf32> to vector<4x8x8xf32>
    %101 = arith.subf %97, %100 : vector<4x8x8xf32>
    %102 = math.exp %101 : vector<4x8x8xf32>
    %cst_50 = arith.constant dense<0.000000e+00> : vector<4x8xf32>
    %103 = vector.multi_reduction <add>, %102, %cst_50 [2] : vector<4x8x8xf32> to vector<4x8xf32>
    %104 = vector.shape_cast %103 : vector<4x8xf32> to vector<4x8x1xf32>
    %105 = tpu.reciprocal %104 {approx = true} : vector<4x8x1xf32> -> vector<4x8x1xf32>
    %106 = vector.broadcast %105 : vector<4x8x1xf32> to vector<4x8x8xf32>
    %107 = arith.mulf %102, %106 : vector<4x8x8xf32>
    %108 = arith.truncf %107 : vector<4x8x8xf32> to vector<4x8x8xbf16>
    %109 = arith.truncf %76 : vector<4x8x8xf32> to vector<4x8x8xbf16>
    "tpu.trace_start"() <{level = 10 : i32, message = "hqk,hkd->hqd"}> : () -> ()
    %cst_51 = arith.constant dense<0.000000e+00> : vector<4x8x8xf32>
    %110 = tpu.matmul %108, %109, %cst_51 {dimension_numbers = #tpu.dot_dimension_numbers<[2], [1], [1], [2], [0, 0, 0, 1, 1, 2], [0], [0]>} : vector<4x8x8xbf16>, vector<4x8x8xbf16>, vector<4x8x8xf32> -> vector<4x8x8xf32>
    "tpu.trace_stop"() : () -> ()
    %111 = arith.truncf %110 : vector<4x8x8xf32> to vector<4x8x8xbf16>
    %c0_52 = arith.constant 0 : index
    %c0_53 = arith.constant 0 : index
    %c0_54 = arith.constant 0 : index
    %112 = vector.load %arg13[%c0_52, %c0_53, %c0_54] : memref<4x8x32xbf16, #tpu.memory_space<vmem>>, vector<4x8x32xbf16>
    "tpu.trace_start"() <{level = 10 : i32, message = "hqd,hdm->hqm"}> : () -> ()
    %cst_55 = arith.constant dense<0.000000e+00> : vector<4x8x32xf32>
    %113 = tpu.matmul %111, %112, %cst_55 {dimension_numbers = #tpu.dot_dimension_numbers<[2], [1], [1], [2], [0, 0, 0, 1, 1, 2], [0], [0]>} : vector<4x8x8xbf16>, vector<4x8x32xbf16>, vector<4x8x32xf32> -> vector<4x8x32xf32>
    "tpu.trace_stop"() : () -> ()
    %cst_56 = arith.constant dense<0.000000e+00> : vector<8x32xf32>
    %114 = vector.multi_reduction <add>, %113, %cst_56 [0] : vector<4x8x32xf32> to vector<8x32xf32>
    %c0_57 = arith.constant 0 : index
    %c0_58 = arith.constant 0 : index
    %115 = vector.load %arg14[%c0_57, %c0_58] : memref<1x32xf32, #tpu.memory_space<vmem>>, vector<1x32xf32>
    %116 = vector.broadcast %115 : vector<1x32xf32> to vector<8x32xf32>
    %117 = arith.addf %114, %116 : vector<8x32xf32>
    %118 = arith.addf %117, %1 : vector<8x32xf32>
    %c0_59 = arith.constant 0 : index
    %c0_60 = arith.constant 0 : index
    %c0_61 = arith.constant 0 : index
    %119 = vector.load %arg15[%c0_59, %c0_60, %c0_61] : memref<1x8x32xf32, #tpu.memory_space<vmem>>, vector<1x8x32xf32>
    %120 = vector.shape_cast %119 : vector<1x8x32xf32> to vector<8x32xf32>
    %121 = vector.shape_cast %118 : vector<8x32xf32> to vector<1x8x32xf32>
    tpu.vector_store %arg15[%c0_59, %c0_60, %c0_61], %121 {strides = array<i32>} : memref<1x8x32xf32, #tpu.memory_space<vmem>>, vector<1x8x32xf32>,
    return
  }
  func.func @transform_0(%arg0: i32, %arg1: i32) -> (i32, i32, i32) {
    %c0_i32 = arith.constant 0 : i32
    %c0_i32_0 = arith.constant 0 : i32
    return %arg0, %arg1, %c0_i32 : i32, i32, i32
  }
  func.func @transform_1(%arg0: i32, %arg1: i32) -> (i32, i32, i32) {
    %c0_i32 = arith.constant 0 : i32
    %c0_i32_0 = arith.constant 0 : i32
    %c0_i32_1 = arith.constant 0 : i32
    return %arg0, %c0_i32, %c0_i32_0 : i32, i32, i32
  }
  func.func @transform_2(%arg0: i32, %arg1: i32) -> (i32, i32, i32) {
    %c0_i32 = arith.constant 0 : i32
    %c0_i32_0 = arith.constant 0 : i32
    %c0_i32_1 = arith.constant 0 : i32
    return %arg0, %c0_i32, %c0_i32_0 : i32, i32, i32
  }
  func.func @transform_3(%arg0: i32, %arg1: i32) -> (i32, i32) {
    %c0_i32 = arith.constant 0 : i32
    %c0_i32_0 = arith.constant 0 : i32
    %c0_i32_1 = arith.constant 0 : i32
    return %c0_i32, %c0_i32_0 : i32, i32
  }
  func.func @transform_4(%arg0: i32, %arg1: i32) -> (i32, i32) {
    %c0_i32 = arith.constant 0 : i32
    %c0_i32_0 = arith.constant 0 : i32
    %c0_i32_1 = arith.constant 0 : i32
    return %c0_i32, %c0_i32_0 : i32, i32
  }
  func.func @transform_5(%arg0: i32, %arg1: i32) -> (i32, i32, i32) {
    %c0_i32 = arith.constant 0 : i32
    %c0_i32_0 = arith.constant 0 : i32
    %c0_i32_1 = arith.constant 0 : i32
    %c0_i32_2 = arith.constant 0 : i32
    return %c0_i32, %c0_i32_0, %c0_i32_1 : i32, i32, i32
  }
  func.func @transform_6(%arg0: i32, %arg1: i32) -> (i32, i32, i32) {
    %c0_i32 = arith.constant 0 : i32
    %c0_i32_0 = arith.constant 0 : i32
    %c0_i32_1 = arith.constant 0 : i32
    %c0_i32_2 = arith.constant 0 : i32
    return %c0_i32, %c0_i32_0, %c0_i32_1 : i32, i32, i32
  }
  func.func @transform_7(%arg0: i32, %arg1: i32) -> (i32, i32, i32) {
    %c0_i32 = arith.constant 0 : i32
    %c0_i32_0 = arith.constant 0 : i32
    %c0_i32_1 = arith.constant 0 : i32
    %c0_i32_2 = arith.constant 0 : i32
    return %c0_i32, %c0_i32_0, %c0_i32_1 : i32, i32, i32
  }
  func.func @transform_8(%arg0: i32, %arg1: i32) -> (i32, i32, i32) {
    %c0_i32 = arith.constant 0 : i32
    %c0_i32_0 = arith.constant 0 : i32
    %c0_i32_1 = arith.constant 0 : i32
    %c0_i32_2 = arith.constant 0 : i32
    return %c0_i32, %c0_i32_0, %c0_i32_1 : i32, i32, i32
  }
  func.func @transform_9(%arg0: i32, %arg1: i32) -> (i32, i32, i32) {
    %c0_i32 = arith.constant 0 : i32
    %c0_i32_0 = arith.constant 0 : i32
    %c0_i32_1 = arith.constant 0 : i32
    %c0_i32_2 = arith.constant 0 : i32
    return %c0_i32, %c0_i32_0, %c0_i32_1 : i32, i32, i32
  }
  func.func @transform_10(%arg0: i32, %arg1: i32) -> (i32, i32, i32) {
    %c0_i32 = arith.constant 0 : i32
    %c0_i32_0 = arith.constant 0 : i32
    %c0_i32_1 = arith.constant 0 : i32
    %c0_i32_2 = arith.constant 0 : i32
    return %c0_i32, %c0_i32_0, %c0_i32_1 : i32, i32, i32
  }
  func.func @transform_11(%arg0: i32, %arg1: i32) -> (i32, i32, i32) {
    %c0_i32 = arith.constant 0 : i32
    %c0_i32_0 = arith.constant 0 : i32
    %c0_i32_1 = arith.constant 0 : i32
    %c0_i32_2 = arith.constant 0 : i32
    return %c0_i32, %c0_i32_0, %c0_i32_1 : i32, i32, i32
  }
  func.func @transform_12(%arg0: i32, %arg1: i32) -> (i32, i32) {
    %c0_i32 = arith.constant 0 : i32
    %c0_i32_0 = arith.constant 0 : i32
    %c0_i32_1 = arith.constant 0 : i32
    return %c0_i32, %c0_i32_0 : i32, i32
  }
  func.func @transform_13(%arg0: i32, %arg1: i32) -> (i32, i32, i32) {
    %c0_i32 = arith.constant 0 : i32
    %c0_i32_0 = arith.constant 0 : i32
    return %arg0, %arg1, %c0_i32 : i32, i32, i32
  }
}

module attributes {stable_mosaic.version = 11 : i64} {
  func.func @_ffn_kernel(%arg0: i32, %arg1: i32, %arg2: memref<1x8x32xf32, #tpu.memory_space<vmem>>, %arg3: memref<1x32xf32, #tpu.memory_space<vmem>>, %arg4: memref<1x32xf32, #tpu.memory_space<vmem>>, %arg5: memref<32x64xbf16, #tpu.memory_space<vmem>>, %arg6: memref<1x64xf32, #tpu.memory_space<vmem>>, %arg7: memref<64x32xbf16, #tpu.memory_space<vmem>>, %arg8: memref<1x32xf32, #tpu.memory_space<vmem>>, %arg9: memref<1x8x32xf32, #tpu.memory_space<vmem>>) attributes {dimension_semantics = [#tpu.dimension_semantics<parallel>, #tpu.dimension_semantics<parallel>], iteration_bounds = array<i64: 2, 1>, scalar_prefetch = 0 : i64, scratch_operands = 0 : i64, tpu.core_type = #tpu.core_type<tc>, window_params = [{transform_indices = @transform_0, window_bounds = array<i64: 1, 8, 32>}, {pipeline_mode = #tpu.pipeline_mode<synchronous>, transform_indices = @transform_1, window_bounds = array<i64: 1, 32>}, {pipeline_mode = #tpu.pipeline_mode<synchronous>, transform_indices = @transform_2, window_bounds = array<i64: 1, 32>}, {pipeline_mode = #tpu.pipeline_mode<synchronous>, transform_indices = @transform_3, window_bounds = array<i64: 32, 64>}, {pipeline_mode = #tpu.pipeline_mode<synchronous>, transform_indices = @transform_4, window_bounds = array<i64: 1, 64>}, {pipeline_mode = #tpu.pipeline_mode<synchronous>, transform_indices = @transform_5, window_bounds = array<i64: 64, 32>}, {pipeline_mode = #tpu.pipeline_mode<synchronous>, transform_indices = @transform_6, window_bounds = array<i64: 1, 32>}, {transform_indices = @transform_7, window_bounds = array<i64: 1, 8, 32>}]} {
    %c0 = arith.constant 0 : index
    %c0_0 = arith.constant 0 : index
    %c0_1 = arith.constant 0 : index
    %0 = vector.load %arg2[%c0, %c0_0, %c0_1] : memref<1x8x32xf32, #tpu.memory_space<vmem>>, vector<1x8x32xf32>
    %1 = vector.shape_cast %0 : vector<1x8x32xf32> to vector<8x32xf32>
    %c0_2 = arith.constant 0 : index
    %c0_3 = arith.constant 0 : index
    %2 = vector.load %arg3[%c0_2, %c0_3] : memref<1x32xf32, #tpu.memory_space<vmem>>, vector<1x32xf32>
    %c0_4 = arith.constant 0 : index
    %c0_5 = arith.constant 0 : index
    %3 = vector.load %arg4[%c0_4, %c0_5] : memref<1x32xf32, #tpu.memory_space<vmem>>, vector<1x32xf32>
    %cst = arith.constant dense<0.000000e+00> : vector<8xf32>
    %4 = vector.multi_reduction <add>, %1, %cst [1] : vector<8x32xf32> to vector<8xf32>
    %5 = vector.shape_cast %4 : vector<8xf32> to vector<8x1xf32>
    %cst_6 = arith.constant 3.200000e+01 : f32
    %6 = vector.broadcast %cst_6 : f32 to vector<8x1xf32>
    %7 = arith.divf %5, %6 : vector<8x1xf32>
    %8 = vector.broadcast %7 : vector<8x1xf32> to vector<8x32xf32>
    %9 = arith.subf %1, %8 : vector<8x32xf32>
    %10 = arith.mulf %9, %9 : vector<8x32xf32>
    %cst_7 = arith.constant dense<0.000000e+00> : vector<8xf32>
    %11 = vector.multi_reduction <add>, %10, %cst_7 [1] : vector<8x32xf32> to vector<8xf32>
    %12 = vector.shape_cast %11 : vector<8xf32> to vector<8x1xf32>
    %cst_8 = arith.constant 3.200000e+01 : f32
    %13 = vector.broadcast %cst_8 : f32 to vector<8x1xf32>
    %14 = arith.divf %12, %13 : vector<8x1xf32>
    %15 = vector.broadcast %7 : vector<8x1xf32> to vector<8x32xf32>
    %16 = arith.subf %1, %15 : vector<8x32xf32>
    %cst_9 = arith.constant 9.99999974E-6 : f32
    %17 = vector.broadcast %cst_9 : f32 to vector<8x1xf32>
    %18 = arith.addf %14, %17 : vector<8x1xf32>
    %19 = math.rsqrt %18 : vector<8x1xf32>
    %20 = vector.broadcast %19 : vector<8x1xf32> to vector<8x32xf32>
    %21 = arith.mulf %16, %20 : vector<8x32xf32>
    %22 = vector.broadcast %2 : vector<1x32xf32> to vector<8x32xf32>
    %23 = arith.mulf %21, %22 : vector<8x32xf32>
    %24 = vector.broadcast %3 : vector<1x32xf32> to vector<8x32xf32>
    %25 = arith.addf %23, %24 : vector<8x32xf32>
    %26 = arith.truncf %25 : vector<8x32xf32> to vector<8x32xbf16>
    %c0_10 = arith.constant 0 : index
    %c0_11 = arith.constant 0 : index
    %27 = vector.load %arg5[%c0_10, %c0_11] : memref<32x64xbf16, #tpu.memory_space<vmem>>, vector<32x64xbf16>
    %cst_12 = arith.constant dense<0.000000e+00> : vector<8x64xf32>
    %28 = tpu.matmul %26, %27, %cst_12 {dimension_numbers = #tpu.dot_dimension_numbers<[1], [0], [0], [1], [0, 0, 1, 1], [], []>} : vector<8x32xbf16>, vector<32x64xbf16>, vector<8x64xf32> -> vector<8x64xf32>
    %c0_13 = arith.constant 0 : index
    %c0_14 = arith.constant 0 : index
    %29 = vector.load %arg6[%c0_13, %c0_14] : memref<1x64xf32, #tpu.memory_space<vmem>>, vector<1x64xf32>
    %30 = vector.broadcast %29 : vector<1x64xf32> to vector<8x64xf32>
    %31 = arith.addf %28, %30 : vector<8x64xf32>
    %cst_15 = arith.constant 0.000000e+00 : f32
    %32 = vector.broadcast %cst_15 : f32 to vector<8x64xf32>
    %33 = arith.maximumf %31, %32 : vector<8x64xf32>
    %34 = arith.truncf %33 : vector<8x64xf32> to vector<8x64xbf16>
    %c0_16 = arith.constant 0 : index
    %c0_17 = arith.constant 0 : index
    %35 = vector.load %arg7[%c0_16, %c0_17] : memref<64x32xbf16, #tpu.memory_space<vmem>>, vector<64x32xbf16>
    %cst_18 = arith.constant dense<0.000000e+00> : vector<8x32xf32>
    %36 = tpu.matmul %34, %35, %cst_18 {dimension_numbers = #tpu.dot_dimension_numbers<[1], [0], [0], [1], [0, 0, 1, 1], [], []>} : vector<8x64xbf16>, vector<64x32xbf16>, vector<8x32xf32> -> vector<8x32xf32>
    %c0_19 = arith.constant 0 : index
    %c0_20 = arith.constant 0 : index
    %37 = vector.load %arg8[%c0_19, %c0_20] : memref<1x32xf32, #tpu.memory_space<vmem>>, vector<1x32xf32>
    %38 = vector.broadcast %37 : vector<1x32xf32> to vector<8x32xf32>
    %39 = arith.addf %36, %38 : vector<8x32xf32>
    %40 = arith.addf %39, %1 : vector<8x32xf32>
    %c0_21 = arith.constant 0 : index
    %c0_22 = arith.constant 0 : index
    %c0_23 = arith.constant 0 : index
    %41 = vector.load %arg9[%c0_21, %c0_22, %c0_23] : memref<1x8x32xf32, #tpu.memory_space<vmem>>, vector<1x8x32xf32>
    %42 = vector.shape_cast %41 : vector<1x8x32xf32> to vector<8x32xf32>
    %43 = vector.shape_cast %40 : vector<8x32xf32> to vector<1x8x32xf32>
    tpu.vector_store %arg9[%c0_21, %c0_22, %c0_23], %43 {strides = array<i32>} : memref<1x8x32xf32, #tpu.memory_space<vmem>>, vector<1x8x32xf32>,
    return
  }
  func.func @transform_0(%arg0: i32, %arg1: i32) -> (i32, i32, i32) {
    %c0_i32 = arith.constant 0 : i32
    %c0_i32_0 = arith.constant 0 : i32
    return %arg0, %arg1, %c0_i32 : i32, i32, i32
  }
  func.func @transform_1(%arg0: i32, %arg1: i32) -> (i32, i32) {
    %c0_i32 = arith.constant 0 : i32
    %c0_i32_0 = arith.constant 0 : i32
    %c0_i32_1 = arith.constant 0 : i32
    return %c0_i32, %c0_i32_0 : i32, i32
  }
  func.func @transform_2(%arg0: i32, %arg1: i32) -> (i32, i32) {
    %c0_i32 = arith.constant 0 : i32
    %c0_i32_0 = arith.constant 0 : i32
    %c0_i32_1 = arith.constant 0 : i32
    return %c0_i32, %c0_i32_0 : i32, i32
  }
  func.func @transform_3(%arg0: i32, %arg1: i32) -> (i32, i32) {
    %c0_i32 = arith.constant 0 : i32
    %c0_i32_0 = arith.constant 0 : i32
    %c0_i32_1 = arith.constant 0 : i32
    return %c0_i32, %c0_i32_0 : i32, i32
  }
  func.func @transform_4(%arg0: i32, %arg1: i32) -> (i32, i32) {
    %c0_i32 = arith.constant 0 : i32
    %c0_i32_0 = arith.constant 0 : i32
    %c0_i32_1 = arith.constant 0 : i32
    return %c0_i32, %c0_i32_0 : i32, i32
  }
  func.func @transform_5(%arg0: i32, %arg1: i32) -> (i32, i32) {
    %c0_i32 = arith.constant 0 : i32
    %c0_i32_0 = arith.constant 0 : i32
    %c0_i32_1 = arith.constant 0 : i32
    return %c0_i32, %c0_i32_0 : i32, i32
  }
  func.func @transform_6(%arg0: i32, %arg1: i32) -> (i32, i32) {
    %c0_i32 = arith.constant 0 : i32
    %c0_i32_0 = arith.constant 0 : i32
    %c0_i32_1 = arith.constant 0 : i32
    return %c0_i32, %c0_i32_0 : i32, i32
  }
  func.func @transform_7(%arg0: i32, %arg1: i32) -> (i32, i32, i32) {
    %c0_i32 = arith.constant 0 : i32
    %c0_i32_0 = arith.constant 0 : i32
    return %arg0, %arg1, %c0_i32 : i32, i32, i32
  }
}

module attributes {stable_mosaic.version = 11 : i64} {
  func.func @_ln_kernel(%arg0: i32, %arg1: i32, %arg2: memref<1x8x32xf32, #tpu.memory_space<vmem>>, %arg3: memref<1x32xf32, #tpu.memory_space<vmem>>, %arg4: memref<1x32xf32, #tpu.memory_space<vmem>>, %arg5: memref<1x8x32xf32, #tpu.memory_space<vmem>>) attributes {dimension_semantics = [#tpu.dimension_semantics<parallel>, #tpu.dimension_semantics<parallel>], iteration_bounds = array<i64: 2, 1>, scalar_prefetch = 0 : i64, scratch_operands = 0 : i64, tpu.core_type = #tpu.core_type<tc>, window_params = [{transform_indices = @transform_0, window_bounds = array<i64: 1, 8, 32>}, {pipeline_mode = #tpu.pipeline_mode<synchronous>, transform_indices = @transform_1, window_bounds = array<i64: 1, 32>}, {pipeline_mode = #tpu.pipeline_mode<synchronous>, transform_indices = @transform_2, window_bounds = array<i64: 1, 32>}, {transform_indices = @transform_3, window_bounds = array<i64: 1, 8, 32>}]} {
    %c0 = arith.constant 0 : index
    %c0_0 = arith.constant 0 : index
    %c0_1 = arith.constant 0 : index
    %0 = vector.load %arg2[%c0, %c0_0, %c0_1] : memref<1x8x32xf32, #tpu.memory_space<vmem>>, vector<1x8x32xf32>
    %1 = vector.shape_cast %0 : vector<1x8x32xf32> to vector<8x32xf32>
    %c0_2 = arith.constant 0 : index
    %c0_3 = arith.constant 0 : index
    %2 = vector.load %arg3[%c0_2, %c0_3] : memref<1x32xf32, #tpu.memory_space<vmem>>, vector<1x32xf32>
    %c0_4 = arith.constant 0 : index
    %c0_5 = arith.constant 0 : index
    %3 = vector.load %arg4[%c0_4, %c0_5] : memref<1x32xf32, #tpu.memory_space<vmem>>, vector<1x32xf32>
    %cst = arith.constant dense<0.000000e+00> : vector<8xf32>
    %4 = vector.multi_reduction <add>, %1, %cst [1] : vector<8x32xf32> to vector<8xf32>
    %5 = vector.shape_cast %4 : vector<8xf32> to vector<8x1xf32>
    %cst_6 = arith.constant 3.200000e+01 : f32
    %6 = vector.broadcast %cst_6 : f32 to vector<8x1xf32>
    %7 = arith.divf %5, %6 : vector<8x1xf32>
    %8 = vector.broadcast %7 : vector<8x1xf32> to vector<8x32xf32>
    %9 = arith.subf %1, %8 : vector<8x32xf32>
    %10 = arith.mulf %9, %9 : vector<8x32xf32>
    %cst_7 = arith.constant dense<0.000000e+00> : vector<8xf32>
    %11 = vector.multi_reduction <add>, %10, %cst_7 [1] : vector<8x32xf32> to vector<8xf32>
    %12 = vector.shape_cast %11 : vector<8xf32> to vector<8x1xf32>
    %cst_8 = arith.constant 3.200000e+01 : f32
    %13 = vector.broadcast %cst_8 : f32 to vector<8x1xf32>
    %14 = arith.divf %12, %13 : vector<8x1xf32>
    %15 = vector.broadcast %7 : vector<8x1xf32> to vector<8x32xf32>
    %16 = arith.subf %1, %15 : vector<8x32xf32>
    %cst_9 = arith.constant 9.99999974E-6 : f32
    %17 = vector.broadcast %cst_9 : f32 to vector<8x1xf32>
    %18 = arith.addf %14, %17 : vector<8x1xf32>
    %19 = math.rsqrt %18 : vector<8x1xf32>
    %20 = vector.broadcast %19 : vector<8x1xf32> to vector<8x32xf32>
    %21 = arith.mulf %16, %20 : vector<8x32xf32>
    %22 = vector.broadcast %2 : vector<1x32xf32> to vector<8x32xf32>
    %23 = arith.mulf %21, %22 : vector<8x32xf32>
    %24 = vector.broadcast %3 : vector<1x32xf32> to vector<8x32xf32>
    %25 = arith.addf %23, %24 : vector<8x32xf32>
    %c0_10 = arith.constant 0 : index
    %c0_11 = arith.constant 0 : index
    %c0_12 = arith.constant 0 : index
    %26 = vector.load %arg5[%c0_10, %c0_11, %c0_12] : memref<1x8x32xf32, #tpu.memory_space<vmem>>, vector<1x8x32xf32>
    %27 = vector.shape_cast %26 : vector<1x8x32xf32> to vector<8x32xf32>
    %28 = vector.shape_cast %25 : vector<8x32xf32> to vector<1x8x32xf32>
    tpu.vector_store %arg5[%c0_10, %c0_11, %c0_12], %28 {strides = array<i32>} : memref<1x8x32xf32, #tpu.memory_space<vmem>>, vector<1x8x32xf32>,
    return
  }
  func.func @transform_0(%arg0: i32, %arg1: i32) -> (i32, i32, i32) {
    %c0_i32 = arith.constant 0 : i32
    %c0_i32_0 = arith.constant 0 : i32
    return %arg0, %arg1, %c0_i32 : i32, i32, i32
  }
  func.func @transform_1(%arg0: i32, %arg1: i32) -> (i32, i32) {
    %c0_i32 = arith.constant 0 : i32
    %c0_i32_0 = arith.constant 0 : i32
    %c0_i32_1 = arith.constant 0 : i32
    return %c0_i32, %c0_i32_0 : i32, i32
  }
  func.func @transform_2(%arg0: i32, %arg1: i32) -> (i32, i32) {
    %c0_i32 = arith.constant 0 : i32
    %c0_i32_0 = arith.constant 0 : i32
    %c0_i32_1 = arith.constant 0 : i32
    return %c0_i32, %c0_i32_0 : i32, i32
  }
  func.func @transform_3(%arg0: i32, %arg1: i32) -> (i32, i32, i32) {
    %c0_i32 = arith.constant 0 : i32
    %c0_i32_0 = arith.constant 0 : i32
    return %arg0, %arg1, %c0_i32 : i32, i32, i32
  }
}

</mosaic_0001>

<bundles_post_ra>
// kernel: decoder_forward.9
= control target key start
LH: loop header
LB: loop body
LE: loop exit
PB: predicated region body
PF: predicated region fallthrough
CT: control target
= control target key end

     0   :  { %s715_s24 = smov 0   ;;  %s717_s25 = smov 0   ;;  %s789_s0 = inlined_call_operand.vmem [shape: f32[2,8,32], index: 0, kind: input, shape index: {}, may-alias: {0,7}]   ;;  %s790_s1 = inlined_call_operand.vmem [shape: f32[1,32], index: 1, kind: input, shape index: {}]   ;;  %s791_s2 = inlined_call_operand.vmem [shape: f32[1,32], index: 2, kind: input, shape index: {}]   ;;  %s792_s3 = inlined_call_operand.vmem [shape: bf16[32,64], index: 3, kind: input, shape index: {}]   ;;  %s793_s4 = inlined_call_operand.vmem [shape: f32[1,64], index: 4, kind: input, shape index: {}]   ;;  %s794_s5 = inlined_call_operand.vmem [shape: bf16[64,32], index: 5, kind: input, shape index: {}]   ;;  %s795_s6 = inlined_call_operand.vmem [shape: f32[1,32], index: 6, kind: input, shape index: {}]   ;;  %s796_s7 = inlined_call_operand.vmem [shape: f32[2,8,32], index: 7, kind: output, shape index: {}, may-alias: {0,7}]  }
   0x1   :  { %s719_s26 = smov 0  }
   0x2 LB: > { %s29_s27 = sadd.s32 1, %s667_s25  ;;  %p570_p0 = scmp.ge.s32.totalorder %s671_s26, 1  ;;  %s671_s26 = sphi %s719_s26, %s17_s26   ;;  %s667_s25 = sphi %s717_s25, %s798_s25   ;;  %s663_s24 = sphi %s715_s24, %s797_s24  }
   0x3   : > { %p31_p1 = scmp.ge.s32.totalorder %s29_s27, 2  ;;  %p255_p2 = scmp.lt.s32.totalorder %s671_s26, 3 }
   0x5   : > { %s800_s27 = smov (%p31_p1, %s29_s27), 0  ;;  %p256_p3 = pnand %p570_p0, %p255_p2 }
   0x6   : > { %p291_p4 = scmp.lt.s32.totalorder (!%p256_p3), %s663_s24, 1  ;;  %vm309_vm0 = vcmask (!%p256_p3), 261120   ;;  %v641_v7 = vld [vmem:[%s792_s3] sm:$0xff] (!%p256_p3)   ;;  %v673_v8 = vmov (!%p256_p3), 0.0   ;;  %v642_v9 = vld [vmem:[%s792_s3 + $0x8] sm:$0xff] (!%p256_p3)   ;;  %vm674_vm1 = vmmov (!%p256_p3), 0  }
   0x7   : > { %259 = sbr.rel (%p256_p3) target bundleno = 768 (0x300), region = 48  ;;  %595 = vmatprep.subr.bf16.mxu0 (!%p256_p3), %v673_v8  ;;  %603 = vmatprep.subr.bf16.mxu1 (!%p256_p3), %v673_v8  ;;  %v643_v10 = vld [vmem:[%s794_s5] sm:$0xff] (!%p256_p3)   ;;  %v644_v11 = vld [vmem:[%s794_s5 + $0x8] sm:$0xff] (!%p256_p3)   ;;  %v645_v22 = vld [vmem:[%s794_s5 + $0x10] sm:$0xff] (!%p256_p3)   ;;  %vm446_vm2 = vcmask (!%p256_p3), 523264  }
   0x8   : > { %596 = vmatpush3.bf16.msra.mxu0 (!%p256_p3), %v641_v7  ;;  %599 = vmatprep.mubr.msk.bf16.mxu0 (!%p256_p3), %vm674_vm1, %v673_v8  ;;  %v573_v16 = vld [vmem:[%s790_s1] ss:$0 sm:$0xff] (!%p256_p3)  ;;  %v646_v23 = vld [vmem:[%s794_s5 + $0x18] sm:$0xff] (!%p256_p3)  }
   0x9   : > { %597 = vmatprep.subr.bf16.mxu0 (!%p256_p3), %v673_v8  ;;  %611 = vmatprep.mubr.msk.bf16.mxu1 (!%p256_p3), %vm674_vm1, %v673_v8  ;;  %v574_v18 = vld [vmem:[%s791_s2] ss:$0 sm:$0xff] (!%p256_p3) }
   0xa   : > { %604 = vmatpush3.bf16.msra.mxu1 (!%p256_p3), %v643_v10  ;;  %v575_v24 = vld [vmem:[%s793_s4] ss:$0 sm:$0xff] (!%p256_p3) }
   0xb   : > { %605 = vmatprep.subr.bf16.mxu1 (!%p256_p3), %v673_v8  ;;  %v579_v32 = vld [vmem:[%s795_s6] ss:$0 sm:$0xff] (!%p256_p3) }
   0xc   : > { %598 = vmatpush3.bf16.msra.mxu0 (!%p256_p3), %v642_v9 }
   0xe   : > { %s802_s24 = smov (!%p291_p4, %s663_s24), 1  ;;  %606 = vmatpush3.bf16.msra.mxu1 %v644_v11 }
   0xf   : > { %s571_s28 = sshll.u32 %s802_s24, 3  ;;  %607 = vmatprep.subr.bf16.mxu1 %v673_v8 }
  0x10   : > { %s297_s8 = scalar_lea.vmem %s789_s0, %s571_s28  ;;  %s304_s13 = scalar_lea.vmem %s796_s7, %s571_s28 }
  0x11   : > { %v306_v0 = vld [vmem:[%s297_s8] sm:$0xff] }
  0x12   : > { %v310_v1 = vsel %vm309_vm0, %v306_v0, 0.0  ;;  %608 = vmatpush3.bf16.msra.mxu1 %v645_v22 }
  0x13   : > { %311 = vadd.xlane.f32.xlu0 %v310_v1  ;;  %609 = vmatprep.subr.bf16.mxu1 %v673_v8 }
  0x16   : > { %610 = vmatpush3.bf16.msra.mxu1 %v646_v23 }
  0xa0   : > { %v312_v2 = vpop.xlane.xlu0 %311 }
  0xa1   : > { %v314_v3 = vmul.f32 0.03125, %v312_v2 }
  0xa3   : > { %v315_v4 = vsub.f32 %v306_v0, %v314_v3 }
  0xa5   : > { %v316_v5 = vmul.f32 %v315_v4, %v315_v4 }
  0xa7   : > { %v317_v6 = vsel %vm309_vm0, %v316_v5, 0.0 }
  0xa8   : > { %318 = vadd.xlane.f32.xlu0 %v317_v6 }
 0x135   : > { %v319_v12 = vpop.xlane.xlu0 %318 }
 0x136   : > { %v320_v13 = vmul.f32 0.03125, %v319_v12 }
 0x138   : > { %v321_v14 = vadd.f32 1e-05, %v320_v13 }
 0x13a   : > { %647 = vrsqrt.f32 %v321_v14 }
 0x144   : > { %v648_v15 = vpop.eup %647 }
 0x145   : > { %v323_v17 = vmul.f32 %v648_v15, %v315_v4 }
 0x147   : > { %v330_v19 = vmul.f32 %v573_v16, %v323_v17 }
 0x149   : > { %v337_v20 = vadd.f32 %v574_v18, %v330_v19 }
 0x14b   : > { %v338_v21 = vpack.c.bf16 %v337_v20, %v337_v20 }
 0x14d   : > { %600 = vmatmul.mubr.msk.bf16.vlgmr.msra.gmra.mrb[0].mxu0 %vm309_vm0, %v338_v21 }
 0x220   : > { %v399_v25 = vpop.f32.mrb[0].mxu0 }
 0x221   : > { %v400_v26 = vadd.f32 %v575_v24, %v399_v25  ;;  %v601_v27 = vpop.f32.mrb[1].mxu0 }
 0x222   : > { %v402_v28 = vpop.f32.mrb[2].mxu0 }
 0x223   : > { %v405_v29 = vmax.f32 %v400_v26, 0.0  ;;  %v602_v30 = vpop.f32.mrb[3].mxu0 }
 0x225   : > { %v406_v31 = vpack.c.bf16 %v405_v29, %v405_v29 }
 0x227   : > { %612 = vmatmul.mubr.msk.bf16.vlgmr.msra.gmra.mrb[0].mxu1 %vm446_vm2, %v406_v31 }
 0x2fa   : > { %v484_v33 = vpop.f32.mrb[0].mxu1 }
 0x2fb   : > { %v485_v34 = vadd.f32 %v579_v32, %v484_v33  ;;  %v613_v35 = vpop.f32.mrb[1].mxu1 }
 0x2fc   : > { %v487_v36 = vpop.f32.mrb[2].mxu1 }
 0x2fd   : > { %v490_v37 = vadd.f32 %v485_v34, %v306_v0  ;;  %v614_v38 = vpop.f32.mrb[3].mxu1 }
 0x2ff   : > { %491 = vst.msk [vmem:[%s304_s13] sm:$0xff] %vm309_vm0, %v490_v37 }
 0x300 PF: > { %s17_s26 = sadd.s32 1, %s671_s26   ;;  %s797_s24 = smov %s667_s25 }
 0x301   : > { %p14_p5 = scmp.ge.s32.totalorder %s17_s26, 4   ;;  %s798_s25 = smov %s800_s27 }
 0x303   :  { %16 = sbr.rel (!%p14_p5) target bundleno = 2 (0x2), region = 78 }

// kernel: decoder_forward.13
= control target key start
LH: loop header
LB: loop body
LE: loop exit
PB: predicated region body
PF: predicated region fallthrough
CT: control target
= control target key end

     0   :  { %8 = vsyncpa [#allocation3], 0  ;;  %s727_s0 = inlined_call_operand.hbm [shape: f32[2,8,32], index: 0, kind: input, shape index: {}, may-alias: {0,3}]   ;;  %s728_s1 = inlined_call_operand.vmem [shape: f32[1,32], index: 1, kind: input, shape index: {}]   ;;  %s729_s2 = inlined_call_operand.vmem [shape: f32[1,32], index: 2, kind: input, shape index: {}]   ;;  %s730_s3 = inlined_call_operand.hbm [shape: f32[2,8,32], index: 3, kind: output, shape index: {}, may-alias: {0,3}]  }
   0x1   :  { %10 = vsyncpa [#allocation3 + $0x1], 0 }
   0x2   :  { %11 = vsyncpa [#allocation4], 0 }
   0x3   :  { %13 = vsyncpa [#allocation4 + $0x1], 0  ;;  %s546_s12 = smov 0   ;;  %s548_s13 = smov 0  }
   0x4   :  { %s550_s14 = smov 0   ;;  %s552_s15 = smov 0  }
   0x5   :  { %s554_s16 = smov 0   ;;  %s556_s17 = smov 0  }
   0x6 LB: > { %s331_s18 = sadd.s32 4294967295, %s522_s17   ;;  %s332_s19 = sadd.s32 4294967294, %s522_s17   ;;  %s522_s17 = sphi %s556_s17, %s19_s17   ;;  %s518_s16 = sphi %s554_s16, %s746_s16   ;;  %s514_s15 = sphi %s552_s15, %s745_s15   ;;  %s510_s14 = sphi %s550_s14, %s744_s14   ;;  %s506_s13 = sphi %s548_s13, %s743_s13   ;;  %s502_s12 = sphi %s546_s12, %s742_s12  }
   0x7   : > { %s31_s20 = sadd.s32 1, %s518_s16  ;;  %s40_s21 = sadd.s32 1, %s510_s14 }
   0x8   : > { %p33_p0 = scmp.ge.s32.totalorder %s31_s20, 2  ;;  %p47_p1 = scmp.ne.s32.totalorder %s510_s14, %s506_s13 }
   0x9   : > { %p48_p2 = scmp.eq.s32.totalorder %s522_s17, 0  ;;  %p53_p3 = scmp.ne.s32.totalorder %s506_s13, %s502_s12 }
   0xa   : > { %s748_s20 = smov (%p33_p0, %s31_s20), 0  ;;  %p54_p5 = scmp.eq.s32.totalorder %s331_s18, 0 }
   0xb   : > { %p587_p4 = por %p48_p2, %p47_p1  ;;  %s35_s23 = ssub.s32 %s518_s16, %s748_s20 }
   0xc   : > { %p121_p6 = scmp.eq.s32.totalorder %s331_s18, 1  ;;  %p38_p7 = scmp.eq.s32.totalorder %s35_s23, 0 }
   0xd   : > { %p593_p8 = por %p54_p5, %p53_p3  ;;  %p127_p10 = scmp.eq.s32.totalorder %s332_s19, 1 }
   0xe   : > { %p597_p9 = por %p121_p6, %p47_p1  ;;  %p358_p13 = scmp.lt.s32.totalorder %s522_s17, 2 }
   0xf   : > { %s602_s26 = scalar_select %p38_p7, %s510_s14, %s40_s21  }
  0x10   : > { %s734_s25 = scalar_select %p597_p9, 1, 0 }
  0x11   : > { %p604_p11 = por %p127_p10, %p53_p3  ;;  %s153_s28 = sand.u32 1, %s510_s14  }
  0x12   : > { %s335_s29 = sshll.u32 %s153_s28, 3  ;;  %s336_s30 = sshll.u32 %s518_s16, 7 }
  0x13   : > { %s735_s27 = scalar_select %p604_p11, 1, 0 }
  0x14   : > { %s615_s6 = scalar_lea.hbm %s727_s0, %s336_s30  ;;  %s157_s7 = scalar_lea.vmem [#allocation2], %s335_s29 }
  0x15   : > { %s165_s8 = sshll.u32 %s157_s7, 4  ;;  %p621_p0 = pnand %p358_p13, %p587_p4  ;;  %s617_s8 = int_to_ptr.vmem [resolvable:$true] %s165_s8 }
  0x16   : > { %s154_s10 = scalar_lea.sflag [#allocation3], %s153_s28  ;;  %s410_s11 = scalar_lea.hbm %s615_s6, 128 }
  0x17   : > { %p411_p3 = scmp.ne.s32.totalorder %s615_s6, %s410_s11  ;;  %p412_p5 = pneg %p621_p0 }
  0x18   : > { %s415_s21 = scalar_lea.hbm %s727_s0, 256  ;;  %p416_p4 = scmp.lt.u32.totalorder %s615_s6, %s727_s0 }
  0x19   : > { %p413_p6 = pnand %p412_p5, %p411_p3  ;;  %p417_p10 = scmp.lt.u32.totalorder %s415_s21, %s410_s11 }
  0x1a   : > { %p419_p12 = scmp.lt.u32.totalorder %s410_s11, %s615_s6 }
  0x1b   : > { %p414_p7 = pneg %p413_p6  ;;  %p418_p13 = por %p417_p10, %p416_p4 }
  0x1d   : > { %p420_p1 = por %p419_p12, %p418_p13 }
  0x1f   : > { %p421_p2 = pnand %p420_p1, %p414_p7 }
  0x21   : > { %424 = shalt.err (!%p421_p2)
}
  0x22   : > { %s425_s28 = scalar_lea.vmem %s617_s8, 128  ;;  %s524_s29 = smov [#allocation2]  }
  0x23   : > { %p426_p3 = scmp.ne.s32.totalorder %s617_s8, %s425_s28  ;;  %s430_s30 = sshll.u32 %s524_s29, 4  ;;  %s431_s30 = int_to_ptr.vmem [resolvable:$false] %s430_s30 }
  0x24   : > { %s432_s4 = scalar_lea.vmem %s431_s30, 256  ;;  %p433_p9 = scmp.lt.s32.totalorder %s617_s8, %s431_s30 }
  0x25   : > { %p428_p6 = pnand %p426_p3, %p412_p5  ;;  %p434_p4 = scmp.lt.s32.totalorder %s432_s4, %s425_s28 }
  0x27   : > { %p429_p11 = pneg %p428_p6  ;;  %p435_p10 = por %p434_p4, %p433_p9 }
  0x29   : > { %p436_p12 = pnand %p435_p10, %p429_p11 }
  0x2b   : > { %439 = shalt.err (!%p436_p12)
}
  0x2c   : > { %353 = dma.hbm_to_vmem [thread:$0]  (!%p621_p0), %s615_s6, 128, %s617_s8, %s154_s10  }
  0x2d   : > { %p737_p1 = scmp.lt.s32.totalorder %s522_s17, 3  ;;  %p738_p2 = scmp.ge.s32.totalorder %s522_s17, 1 }
  0x2f   : > { %p171_p5 = pnand %p738_p2, %p737_p1 }
  0x30   : > { %s657_s5 = sand.u32 (!%p171_p5), 1, %s506_s13  }
  0x31   : > { %174 = sbr.rel (%p171_p5) target bundleno = 385 (0x181), region = 32  ;;  %s338_s7 = sshll.u32 (!%p171_p5), %s657_s5, 3 }
  0x32   : > { %s177_s11 = scalar_lea.sflag (!%p171_p5), [#allocation3], %s657_s5  ;;  %s180_s18 = scalar_lea.vmem (!%p171_p5), [#allocation2], %s338_s7 }
  0x38   : > { %493 = dma.done.wait (%p593_p8), %s177_s11, 128  }
  0x39   : > { %495 = vsyncadd (%p593_p8), %s177_s11, 4294967168  ;;  %vm206_vm0 = vcmask 261120   ;;  %v203_v0 = vld [vmem:[%s180_s18] sm:$0xff]  ;;  %s343_s10 = sshll.u32 %s514_s15, 7  ;;  %s202_s19 = scalar_lea.vmem [#allocation5], %s338_s7 }
  0x3a   : > { %v207_v1 = vsel %vm206_vm0, %v203_v0, 0.0  ;;  %v340_v11 = vld [vmem:[%s728_s1] ss:$0 sm:$0xff]  ;;  %s251_s21 = sshll.u32 %s202_s19, 4  ;;  %s677_s28 = scalar_lea.hbm %s730_s3, %s343_s10  ;;  %s679_s21 = int_to_ptr.vmem [resolvable:$true] %s251_s21 }
  0x3b   : > { %208 = vadd.xlane.f32.xlu0 %v207_v1  ;;  %v341_v13 = vld [vmem:[%s729_s2] ss:$0 sm:$0xff]  ;;  %s237_s29 = scalar_lea.sflag [#allocation4], %s657_s5  ;;  %s440_s30 = scalar_lea.vmem %s679_s21, 128 }
  0x3c   : > { %p441_p8 = scmp.ne.s32.totalorder %s679_s21, %s440_s30  ;;  %p739_p9 = scmp.ne.s32.totalorder %s734_s25, 0 }
  0x3d   : > { %s525_s15 = smov [#allocation5]  }
  0x3e   : > { %p442_p11 = pnand %p441_p8, %p739_p9  ;;  %s444_s4 = sshll.u32 %s525_s15, 4  ;;  %s445_s4 = int_to_ptr.vmem [resolvable:$false] %s444_s4 }
  0x3f   : > { %s446_s7 = scalar_lea.vmem %s445_s4, 256  ;;  %p447_p7 = scmp.lt.s32.totalorder %s679_s21, %s445_s4 }
  0x40   : > { %p443_p0 = pneg %p442_p11  ;;  %p448_p13 = scmp.lt.s32.totalorder %s446_s7, %s440_s30 }
  0x42   : > { %p449_p3 = por %p448_p13, %p447_p7 }
  0x44   : > { %p450_p6 = pnand %p449_p3, %p443_p0 }
  0xc8   : > { %v209_v2 = vpop.xlane.xlu0 %208 }
  0xc9   : > { %v211_v3 = vmul.f32 0.03125, %v209_v2 }
  0xcb   : > { %v212_v4 = vsub.f32 %v203_v0, %v211_v3 }
  0xcd   : > { %v213_v5 = vmul.f32 %v212_v4, %v212_v4 }
  0xcf   : > { %v214_v6 = vsel %vm206_vm0, %v213_v5, 0.0 }
  0xd0   : > { %215 = vadd.xlane.f32.xlu0 %v214_v6 }
 0x15d   : > { %v216_v7 = vpop.xlane.xlu0 %215 }
 0x15e   : > { %v217_v8 = vmul.f32 0.03125, %v216_v7 }
 0x160   : > { %v218_v9 = vadd.f32 1e-05, %v217_v8 }
 0x162   : > { %408 = vrsqrt.f32 %v218_v9 }
 0x16c   : > { %v409_v10 = vpop.eup %408 }
 0x16d   : > { %v220_v12 = vmul.f32 %v409_v10, %v212_v4 }
 0x16f   : > { %v227_v14 = vmul.f32 %v340_v11, %v220_v12 }
 0x171   : > { %v234_v15 = vadd.f32 %v341_v13, %v227_v14 }
 0x173   : > { %235 = vst.msk [vmem:[%s202_s19] sm:$0xff] %vm206_vm0, %v234_v15 }
 0x174   : > { %453 = shalt.err (!%p450_p6)
}
 0x175   : > { %s454_s5 = scalar_lea.hbm %s677_s28, 128  ;;  %s458_s24 = scalar_lea.hbm %s730_s3, 256 }
 0x176   : > { %p455_p4 = scmp.ne.s32.totalorder %s677_s28, %s454_s5  ;;  %p459_p1 = scmp.lt.u32.totalorder %s677_s28, %s730_s3 }
 0x177   : > { %p460_p2 = scmp.lt.u32.totalorder %s458_s24, %s454_s5  ;;  %p462_p8 = scmp.lt.u32.totalorder %s454_s5, %s677_s28 }
 0x178   : > { %p456_p10 = pnand %p455_p4, %p739_p9 }
 0x179   : > { %p461_p5 = por %p460_p2, %p459_p1 }
 0x17a   : > { %p457_p12 = pneg %p456_p10 }
 0x17b   : > { %p463_p11 = por %p462_p8, %p461_p5 }
 0x17d   : > { %p464_p0 = pnand %p463_p11, %p457_p12 }
 0x17f   : > { %467 = shalt.err (!%p464_p0)
}
 0x180   : > { %348 = dma.vmem_to_hbm [thread:$0]  (%p739_p9), %s679_s21, 128, %s677_s28, %s237_s29  }
 0x181 PF: > { %s263_s9 = sand.u32 1, %s502_s12   ;;  %p740_p7 = scmp.ne.s32.totalorder %s735_s27, 0 }
 0x182   : > { %p741_p13 = scmp.ge.s32.totalorder %s522_s17, 2  ;;  %s264_s10 = scalar_lea.sflag [#allocation4], %s263_s9 }
 0x184   : > { %p355_p3 = pnand %p741_p13, %p740_p7 }
 0x186   : > { %497 = dma.done.wait (!%p355_p3), %s264_s10, 128  }
 0x187   : > { %499 = vsyncadd (!%p355_p3), %s264_s10, 4294967168  ;;  %s19_s17 = sadd.s32 1, %s522_s17   ;;  %s742_s12 = smov %s506_s13 }
 0x188   : > { %p16_p6 = scmp.ge.s32.totalorder %s19_s17, 4   ;;  %s743_s13 = smov %s510_s14 }
 0x189   : > { %s744_s14 = smov %s602_s26  ;;  %s745_s15 = smov %s518_s16 }
 0x18a   : > { %s746_s16 = smov %s748_s20  ;;  %18 = sbr.rel (!%p16_p6) target bundleno = 6 (0x6), region = 77 }
 0x191   :  { %269 = vsyncpa [#allocation3], 1 }
 0x192   :  { %271 = vsyncpa [#allocation3 + $0x1], 1 }
 0x193   :  { %272 = vsyncpa [#allocation4], 1 }
 0x194   :  { %274 = vsyncpa [#allocation4 + $0x1], 1 }

// kernel: decoder_forward.7
= control target key start
LH: loop header
LB: loop body
LE: loop exit
PB: predicated region body
PF: predicated region fallthrough
CT: control target
= control target key end

     0   :  { %s2541_s25 = smov 0   ;;  %s2543_s26 = smov 0   ;;  %s2878_s0 = inlined_call_operand.vmem [shape: f32[2,8,32], index: 0, kind: input, shape index: {}, may-alias: {0,1}]   ;;  %s2879_s1 = inlined_call_operand.vmem [shape: f32[2,8,32], index: 1, kind: input, shape index: {}, may-alias: {0,1}]   ;;  %s2880_s2 = inlined_call_operand.vmem [shape: s32[2,1,8], index: 2, kind: input, shape index: {}]   ;;  %s2881_s3 = inlined_call_operand.vmem [shape: f32[1,32], index: 3, kind: input, shape index: {}]   ;;  %s2882_s4 = inlined_call_operand.vmem [shape: f32[1,32], index: 4, kind: input, shape index: {}]   ;;  %s2883_s5 = inlined_call_operand.vmem [shape: bf16[4,32,8], index: 5, kind: input, shape index: {}]   ;;  %s2884_s6 = inlined_call_operand.vmem [shape: f32[4,1,8], index: 6, kind: input, shape index: {}]   ;;  %s2885_s7 = inlined_call_operand.vmem [shape: bf16[4,32,8], index: 7, kind: input, shape index: {}]   ;;  %s2886_s8 = inlined_call_operand.vmem [shape: f32[4,1,8], index: 8, kind: input, shape index: {}]   ;;  %s2887_s9 = inlined_call_operand.vmem [shape: bf16[4,32,8], index: 9, kind: input, shape index: {}]   ;;  %s2888_s10 = inlined_call_operand.vmem [shape: f32[4,1,8], index: 10, kind: input, shape index: {}]   ;;  %s2889_s11 = inlined_call_operand.vmem [shape: bf16[4,8,32], index: 11, kind: input, shape index: {}]   ;;  %s2890_s12 = inlined_call_operand.vmem [shape: f32[1,32], index: 12, kind: input, shape index: {}]   ;;  %s2891_s13 = inlined_call_operand.vmem [shape: f32[2,8,32], index: 13, kind: output, shape index: {}]  }
   0x1   :  { %s2545_s27 = smov 0  }
   0x2 LB: > { %s35_s28 = sadd.s32 1, %s2462_s26  ;;  %p2076_p0 = scmp.ge.s32.totalorder %s2466_s27, 1  ;;  %s2466_s27 = sphi %s2545_s27, %s23_s27   ;;  %s2462_s26 = sphi %s2543_s26, %s2895_s26   ;;  %s2458_s25 = sphi %s2541_s25, %s2894_s25  }
   0x3   : > { %p37_p1 = scmp.ge.s32.totalorder %s35_s28, 2  ;;  %p422_p2 = scmp.lt.s32.totalorder %s2466_s27, 3 }
   0x5   : > { %s2897_s28 = smov (%p37_p1, %s35_s28), 0  ;;  %p423_p3 = pnand %p2076_p0, %p422_p2 }
   0x6   : > { %p477_p4 = scmp.lt.s32.totalorder (!%p423_p3), %s2458_s25, 1  ;;  %vm504_vm0 = vcmask (!%p423_p3), 261120   ;;  %v2400_v14 = vld [vmem:[%s2883_s5] sm:$0xff] (!%p423_p3)   ;;  %v2401_v15 = vld [vmem:[%s2883_s5 + $0x10] sm:$0xff] (!%p423_p3)   ;;  %v2468_v16 = vmov (!%p423_p3), 0.0   ;;  %v2402_v17 = vld [vmem:[%s2883_s5 + $0x8] sm:$0xff] (!%p423_p3)  }
   0x7   : > { %426 = sbr.rel (%p423_p3) target bundleno = 1547 (0x60b), region = 72  ;;  %2205 = vmatprep.subr.bf16.mxu0 (!%p423_p3), %v2468_v16  ;;  %2213 = vmatprep.subr.bf16.mxu1 (!%p423_p3), %v2468_v16  ;;  %v2403_v18 = vld [vmem:[%s2883_s5 + $0x18] sm:$0xff] (!%p423_p3)   ;;  %vm2469_vm1 = vmmov (!%p423_p3), 0   ;;  %v2080_v26 = vld [vmem:[%s2881_s3] ss:$0 sm:$0xff] (!%p423_p3)  ;;  %v2405_v32 = vld [vmem:[%s2883_s5 + $0x30] sm:$0xff] (!%p423_p3)  }
   0x8   : > { %2206 = vmatpush3.bf16.msra.mxu0 (!%p423_p3), %v2400_v14  ;;  %2214 = vmatpush3.bf16.msra.mxu1 (!%p423_p3), %v2401_v15  ;;  %v2081_v28 = vld [vmem:[%s2882_s4] ss:$0 sm:$0xff] (!%p423_p3)  ;;  %v2406_v35 = vld [vmem:[%s2883_s5 + $0x28] sm:$0xff] (!%p423_p3)   ;;  %v2407_v36 = vld [vmem:[%s2883_s5 + $0x38] sm:$0xff] (!%p423_p3)   ;;  %vm1324_vm2 = vcmask (!%p423_p3), 64512   ;;  %vm1586_vm3 = vcmask (!%p423_p3), 1043456  }
   0x9   : > { %2207 = vmatprep.subr.bf16.mxu0 (!%p423_p3), %v2468_v16  ;;  %2215 = vmatprep.subr.bf16.mxu1 (!%p423_p3), %v2468_v16  ;;  %v2404_v31 = vld [vmem:[%s2883_s5 + $0x20] sm:$0xff] (!%p423_p3)   ;;  %v2409_v39 = vld [vmem:[%s2885_s7 + $0x10] sm:$0xff] (!%p423_p3)   ;;  %v2410_v41 = vld [vmem:[%s2885_s7 + $0x8] sm:$0xff] (!%p423_p3)  }
   0xa   : > { %2209 = vmatprep.mubr.msk.bf16.mxu0 (!%p423_p3), %vm2469_vm1, %v2468_v16  ;;  %2217 = vmatprep.mubr.msk.bf16.mxu1 (!%p423_p3), %vm2469_vm1, %v2468_v16  ;;  %v2408_v38 = vld [vmem:[%s2885_s7] sm:$0xff] (!%p423_p3)   ;;  %v2411_v42 = vld [vmem:[%s2885_s7 + $0x18] sm:$0xff] (!%p423_p3)   ;;  %v2413_v45 = vld [vmem:[%s2885_s7 + $0x30] sm:$0xff] (!%p423_p3)  }
   0xb   : > { %v2412_v44 = vld [vmem:[%s2885_s7 + $0x20] sm:$0xff] (!%p423_p3)   ;;  %v2414_v47 = vld [vmem:[%s2885_s7 + $0x28] sm:$0xff] (!%p423_p3)   ;;  %v2415_v48 = vld [vmem:[%s2885_s7 + $0x38] sm:$0xff] (!%p423_p3)  }
   0xc   : > { %2208 = vmatpush3.bf16.msra.mxu0 (!%p423_p3), %v2402_v17  ;;  %2216 = vmatpush3.bf16.msra.mxu1 (!%p423_p3), %v2403_v18  ;;  %v2416_v49 = vld [vmem:[%s2887_s9] sm:$0xff] (!%p423_p3)   ;;  %v2417_v50 = vld [vmem:[%s2887_s9 + $0x10] sm:$0xff] (!%p423_p3)   ;;  %v2418_v51 = vld [vmem:[%s2887_s9 + $0x8] sm:$0xff] (!%p423_p3)  }
   0xd   : > { %2221 = vmatprep.subr.bf16.mxu0 (!%p423_p3), %v2468_v16  ;;  %2229 = vmatprep.subr.bf16.mxu1 (!%p423_p3), %v2468_v16  ;;  %v2419_v52 = vld [vmem:[%s2887_s9 + $0x18] sm:$0xff] (!%p423_p3)   ;;  %v2420_v53 = vld [vmem:[%s2887_s9 + $0x20] sm:$0xff] (!%p423_p3)   ;;  %v2421_v54 = vld [vmem:[%s2887_s9 + $0x30] sm:$0xff] (!%p423_p3)  }
   0xe   : > { %s2899_s25 = smov (!%p477_p4, %s2458_s25), 1  ;;  %v2422_v55 = vld [vmem:[%s2887_s9 + $0x28] sm:$0xff]   ;;  %v2423_v56 = vld [vmem:[%s2887_s9 + $0x38] sm:$0xff]  }
   0xf   : > { %s2562_s29 = sshll.u32 %s2899_s25, 3  ;;  %s490_s21 = scalar_lea.vmem %s2880_s2, %s2899_s25 }
  0x10   : > { %s483_s15 = scalar_lea.vmem %s2878_s0, %s2562_s29  ;;  %s487_s18 = scalar_lea.vmem %s2879_s1, %s2562_s29 }
  0x11   : > { %v2568_v0 = vld [vmem:[%s483_s15] sm:$0xff]  ;;  %s497_s24 = scalar_lea.vmem %s2891_s13, %s2562_s29 }
  0x12   : > { %v505_v1 = vsel %vm504_vm0, %v2568_v0, 0.0  ;;  %v500_v2 = vld [vmem:[%s487_s18] sm:$0xff] }
  0x13   : > { %506 = vadd.xlane.f32.xlu0 %v505_v1  ;;  %v533_v3 = vsel %vm504_vm0, %v500_v2, 0.0 }
  0x17   : > { %534 = vadd.xlane.f32.xlu0 %v533_v3 }
  0xa0   : > { %v507_v4 = vpop.xlane.xlu0 %506 }
  0xa1   : > { %v509_v5 = vmul.f32 0.03125, %v507_v4 }
  0xa3   : > { %v510_v6 = vsub.f32 %v2568_v0, %v509_v5 }
  0xa4   : > { %v535_v7 = vpop.xlane.xlu0 %534 }
  0xa5   : > { %v536_v8 = vmul.f32 0.03125, %v535_v7  ;;  %v511_v9 = vmul.f32 %v510_v6, %v510_v6 }
  0xa7   : > { %v537_v10 = vsub.f32 %v500_v2, %v536_v8  ;;  %v512_v11 = vsel %vm504_vm0, %v511_v9, 0.0 }
  0xa8   : > { %513 = vadd.xlane.f32.xlu1 %v512_v11  ;;  %v2099_v11 = vld [vmem:[%s2886_s8 + $0x1] ss:$0 sm:$0xff] }
  0xa9   : > { %v538_v12 = vmul.f32 %v537_v10, %v537_v10 }
  0xab   : > { %v539_v13 = vsel %vm504_vm0, %v538_v12, 0.0  ;;  %v2082_v12 = vld [vmem:[%s2884_s6] ss:$0 sm:$0xff] }
  0xac   : > { %540 = vadd.xlane.f32.xlu1 %v539_v13  ;;  %v2083_v13 = vld [vmem:[%s2884_s6 + $0x1] ss:$0 sm:$0xff] }
 0x135   : > { %v514_v19 = vpop.xlane.xlu1 %513 }
 0x136   : > { %v515_v20 = vmul.f32 0.03125, %v514_v19 }
 0x138   : > { %v516_v21 = vadd.f32 1e-05, %v515_v20 }
 0x139   : > { %v541_v22 = vpop.xlane.xlu1 %540 }
 0x13a   : > { %2424 = vrsqrt.f32 %v516_v21  ;;  %v542_v23 = vmul.f32 0.03125, %v541_v22 }
 0x13c   : > { %v543_v24 = vadd.f32 1e-05, %v542_v23 }
 0x13e   : > { %2426 = vrsqrt.f32 %v543_v24 }
 0x144   : > { %v2425_v25 = vpop.eup %2424 }
 0x145   : > { %v518_v27 = vmul.f32 %v2425_v25, %v510_v6 }
 0x147   : > { %v525_v29 = vmul.f32 %v2080_v26, %v518_v27 }
 0x148   : > { %v2427_v34 = vpop.eup %2426 }
 0x149   : > { %v532_v30 = vadd.f32 %v2081_v28, %v525_v29  ;;  %v545_v37 = vmul.f32 %v2427_v34, %v537_v10  ;;  %v2098_v10 = vld [vmem:[%s2886_s8] ss:$0 sm:$0xff]  ;;  %v2101_v34 = vld [vmem:[%s2886_s8 + $0x3] ss:$0 sm:$0xff] }
 0x14b   : > { %v548_v33 = vpack.c.bf16 %v532_v30, %v532_v30  ;;  %v546_v40 = vmul.f32 %v2080_v26, %v545_v37 }
 0x14d   : > { %2210 = vmatmul.mubr.msk.bf16.vlgmr.msra.gmra.mrb[0].mxu0 %vm504_vm0, %v548_v33  ;;  %2218 = vmatmul.mubr.msk.bf16.vlgmr.msra.gmra.mrb[0].mxu1 %vm504_vm0, %v548_v33  ;;  %v547_v43 = vadd.f32 %v2081_v28, %v546_v40 }
 0x14e   : > { %2222 = vmatpush3.bf16.msra.mxu0 %v2404_v31  ;;  %2230 = vmatpush3.bf16.msra.mxu1 %v2405_v32  ;;  %v2100_v31 = vld [vmem:[%s2886_s8 + $0x2] ss:$0 sm:$0xff] }
 0x14f   : > { %2223 = vmatprep.subr.bf16.mxu0 %v2468_v16  ;;  %2231 = vmatprep.subr.bf16.mxu1 %v2468_v16  ;;  %v549_v46 = vpack.c.bf16 %v547_v43, %v547_v43 }
 0x150   : > { %2225 = vmatprep.mubr.msk.bf16.mxu0 %vm2469_vm1, %v2468_v16  ;;  %2233 = vmatprep.mubr.msk.bf16.mxu1 %vm2469_vm1, %v2468_v16 }
 0x152   : > { %2224 = vmatpush3.bf16.msra.mxu0 %v2406_v35  ;;  %2232 = vmatpush3.bf16.msra.mxu1 %v2407_v36  ;;  %v2084_v35 = vld [vmem:[%s2884_s6 + $0x2] ss:$0 sm:$0xff]  ;;  %v2085_v36 = vld [vmem:[%s2884_s6 + $0x3] ss:$0 sm:$0xff] }
 0x153   : > { %2237 = vmatprep.subr.bf16.mxu0 %v2468_v16  ;;  %2245 = vmatprep.subr.bf16.mxu1 %v2468_v16 }
 0x155   : > { %2226 = vmatmul.mubr.msk.bf16.vlgmr.msra.gmra.mrb[4].mxu0 %vm504_vm0, %v548_v33  ;;  %2234 = vmatmul.mubr.msk.bf16.vlgmr.msra.gmra.mrb[4].mxu1 %vm504_vm0, %v548_v33 }
 0x156   : > { %2238 = vmatpush3.bf16.msra.mxu0 %v2408_v38  ;;  %2246 = vmatpush3.bf16.msra.mxu1 %v2409_v39 }
 0x157   : > { %2239 = vmatprep.subr.bf16.mxu0 %v2468_v16  ;;  %2247 = vmatprep.subr.bf16.mxu1 %v2468_v16 }
 0x158   : > { %2241 = vmatprep.mubr.msk.bf16.mxu0 %vm2469_vm1, %v2468_v16  ;;  %2249 = vmatprep.mubr.msk.bf16.mxu1 %vm2469_vm1, %v2468_v16 }
 0x15a   : > { %2240 = vmatpush3.bf16.msra.mxu0 %v2410_v41  ;;  %2248 = vmatpush3.bf16.msra.mxu1 %v2411_v42 }
 0x15b   : > { %2253 = vmatprep.subr.bf16.mxu0 %v2468_v16  ;;  %2261 = vmatprep.subr.bf16.mxu1 %v2468_v16 }
 0x15d   : > { %2242 = vmatmul.mubr.msk.bf16.vlgmr.msra.gmra.mrb[8].mxu0 %vm504_vm0, %v549_v46  ;;  %2250 = vmatmul.mubr.msk.bf16.vlgmr.msra.gmra.mrb[8].mxu1 %vm504_vm0, %v549_v46 }
 0x15e   : > { %2254 = vmatpush3.bf16.msra.mxu0 %v2412_v44  ;;  %2262 = vmatpush3.bf16.msra.mxu1 %v2413_v45 }
 0x15f   : > { %2255 = vmatprep.subr.bf16.mxu0 %v2468_v16  ;;  %2263 = vmatprep.subr.bf16.mxu1 %v2468_v16 }
 0x160   : > { %2257 = vmatprep.mubr.msk.bf16.mxu0 %vm2469_vm1, %v2468_v16  ;;  %2265 = vmatprep.mubr.msk.bf16.mxu1 %vm2469_vm1, %v2468_v16 }
 0x162   : > { %2256 = vmatpush3.bf16.msra.mxu0 %v2414_v47  ;;  %2264 = vmatpush3.bf16.msra.mxu1 %v2415_v48 }
 0x163   : > { %2269 = vmatprep.subr.bf16.mxu0 %v2468_v16  ;;  %2277 = vmatprep.subr.bf16.mxu1 %v2468_v16 }
 0x165   : > { %2258 = vmatmul.mubr.msk.bf16.vlgmr.msra.gmra.mrb[12].mxu0 %vm504_vm0, %v549_v46  ;;  %2266 = vmatmul.mubr.msk.bf16.vlgmr.msra.gmra.mrb[12].mxu1 %vm504_vm0, %v549_v46 }
 0x166   : > { %2270 = vmatpush3.bf16.msra.mxu0 %v2416_v49  ;;  %2278 = vmatpush3.bf16.msra.mxu1 %v2417_v50 }
 0x167   : > { %2271 = vmatprep.subr.bf16.mxu0 %v2468_v16  ;;  %2279 = vmatprep.subr.bf16.mxu1 %v2468_v16 }
 0x168   : > { %2273 = vmatprep.mubr.msk.bf16.mxu0 %vm2469_vm1, %v2468_v16  ;;  %2281 = vmatprep.mubr.msk.bf16.mxu1 %vm2469_vm1, %v2468_v16 }
 0x16a   : > { %2272 = vmatpush3.bf16.msra.mxu0 %v2418_v51  ;;  %2280 = vmatpush3.bf16.msra.mxu1 %v2419_v52 }
 0x16b   : > { %2285 = vmatprep.subr.bf16.mxu0 %v2468_v16  ;;  %2293 = vmatprep.subr.bf16.mxu1 %v2468_v16 }
 0x16d   : > { %2274 = vmatmul.mubr.msk.bf16.vlgmr.msra.gmra.mrb[16].mxu0 %vm504_vm0, %v549_v46  ;;  %2282 = vmatmul.mubr.msk.bf16.vlgmr.msra.gmra.mrb[16].mxu1 %vm504_vm0, %v549_v46 }
 0x16e   : > { %2286 = vmatpush3.bf16.msra.mxu0 %v2420_v53  ;;  %2294 = vmatpush3.bf16.msra.mxu1 %v2421_v54 }
 0x16f   : > { %2287 = vmatprep.subr.bf16.mxu0 %v2468_v16  ;;  %2295 = vmatprep.subr.bf16.mxu1 %v2468_v16 }
 0x170   : > { %2289 = vmatprep.mubr.msk.bf16.mxu0 %vm2469_vm1, %v2468_v16  ;;  %2297 = vmatprep.mubr.msk.bf16.mxu1 %vm2469_vm1, %v2468_v16 }
 0x172   : > { %2288 = vmatpush3.bf16.msra.mxu0 %v2422_v55  ;;  %2296 = vmatpush3.bf16.msra.mxu1 %v2423_v56  ;;  %v2114_v55 = vld [vmem:[%s2888_s10] ss:$0 sm:$0xff]  ;;  %v2115_v56 = vld [vmem:[%s2888_s10 + $0x1] ss:$0 sm:$0xff] }
 0x173   : > { %2301 = vmatprep.subr.bf16.mxu0 %v2468_v16  ;;  %2307 = vmatprep.subr.bf16.mxu1 %v2468_v16 }
 0x175   : > { %2290 = vmatmul.mubr.msk.bf16.vlgmr.msra.gmra.mrb[20].mxu0 %vm504_vm0, %v549_v46  ;;  %2298 = vmatmul.mubr.msk.bf16.vlgmr.msra.gmra.mrb[20].mxu1 %vm504_vm0, %v549_v46 }
 0x176   : > { %2303 = vmatprep.mubr.msk.bf16.mxu0 %vm2469_vm1, %v2468_v16  ;;  %2309 = vmatprep.mubr.msk.bf16.mxu1 %vm2469_vm1, %v2468_v16 }
 0x220   : > { %v643_v57 = vpop.f32.mrb[0].mxu0  ;;  %v695_v58 = vpop.f32.mrb[0].mxu1 }
 0x221   : > { %v2211_v59 = vpop.f32.mrb[1].mxu0  ;;  %v2219_v60 = vpop.f32.mrb[1].mxu1  ;;  %v644_v21 = vadd.f32 %v2082_v12, %v643_v57  ;;  %v696_v22 = vadd.f32 %v2083_v13, %v695_v58 }
 0x222   : > { %v646_v61 = vpop.f32.mrb[2].mxu0  ;;  %v698_v62 = vpop.f32.mrb[2].mxu1 }
 0x223   : > { %v2212_v63 = vpop.f32.mrb[3].mxu0  ;;  %v2220_v1 = vpop.f32.mrb[3].mxu1  ;;  %v1312_v32 = vmul.f32 0.35355338, %v644_v21  ;;  %v1313_v33 = vmul.f32 0.35355338, %v696_v22  ;;  %v1511_v21 = vlaneseq }
 0x224   : > { %v501_v22 = vld [vmem:[%s490_s21] sm:$0x1] }
 0x225   : > { %v1316_v43 = vpack.c.bf16 %v1312_v32, %v1312_v32  ;;  %v1317_v44 = vpack.c.bf16 %v1313_v33, %v1313_v33  ;;  %vm1509_vm4 = vcmp.gt.s32.totalorder %v501_v22, 0 }
 0x228   : > { %v747_v2 = vpop.f32.mrb[4].mxu0  ;;  %v799_v3 = vpop.f32.mrb[4].mxu1 }
 0x229   : > { %v2227_v4 = vpop.f32.mrb[5].mxu0  ;;  %v2235_v5 = vpop.f32.mrb[5].mxu1  ;;  %v748_v47 = vadd.f32 %v2084_v35, %v747_v2  ;;  %v800_v48 = vadd.f32 %v2085_v36, %v799_v3 }
 0x22a   : > { %v750_v6 = vpop.f32.mrb[6].mxu0  ;;  %v802_v7 = vpop.f32.mrb[6].mxu1 }
 0x22b   : > { %v2228_v8 = vpop.f32.mrb[7].mxu0  ;;  %v2236_v9 = vpop.f32.mrb[7].mxu1  ;;  %v1314_v57 = vmul.f32 0.35355338, %v748_v47  ;;  %v1315_v58 = vmul.f32 0.35355338, %v800_v48 }
 0x22d   : > { %v1318_v4 = vpack.c.bf16 %v1314_v57, %v1314_v57  ;;  %v1319_v5 = vpack.c.bf16 %v1315_v58, %v1315_v58 }
 0x230   : > { %v898_v14 = vpop.f32.mrb[8].mxu0  ;;  %v950_v15 = vpop.f32.mrb[8].mxu1 }
 0x231   : > { %v899_v17 = vadd.f32 %v2098_v10, %v898_v14  ;;  %v951_v18 = vadd.f32 %v2099_v11, %v950_v15  ;;  %v2243_v19 = vpop.f32.mrb[9].mxu0  ;;  %v2251_v20 = vpop.f32.mrb[9].mxu1 }
 0x232   : > { %v901_v23 = vpop.f32.mrb[10].mxu0  ;;  %v953_v24 = vpop.f32.mrb[10].mxu1 }
 0x233   : > { %v1320_v25 = vpack.c.bf16 %v899_v17, %v899_v17  ;;  %v1321_v26 = vpack.c.bf16 %v951_v18, %v951_v18  ;;  %v2244_v27 = vpop.f32.mrb[11].mxu0  ;;  %v2252_v28 = vpop.f32.mrb[11].mxu1  ;;  %v1512_v23 = vshrl.u32 %v1511_v21, 7 }
 0x234   : > { %v1522_v28 = vand.u32 127, %v1511_v21 }
 0x235   : > { %v1329_v29 = vsel %vm1324_vm2, %v1320_v25, 0  ;;  %v1375_v30 = vsel %vm1324_vm2, %v1321_v26, 0  ;;  %v1513_v24 = vsub.s32 0, %v1512_v23  ;;  %v2470_v25 = vmov 0  }
 0x236   : > { %2302 = vmatpush3.bf16.xpose.msra.mxu0 %v1329_v29  ;;  %2308 = vmatpush3.bf16.xpose.msra.mxu1 %v1375_v30  ;;  %v1510_v26 = vsel %vm1509_vm4, 1, %v2470_v25  ;;  %vm1523_vm6 = vcmp.gt.s32.totalorder %v1522_v28, %v1512_v23 }
 0x237   : > { %2313 = vmatprep.subr.bf16.mxu0 %v2468_v16  ;;  %2319 = vmatprep.subr.bf16.mxu1 %v2468_v16  ;;  %v1514_v27 = vrot.slane %v1510_v26, %v1513_v24 }
 0x238   : > { %v1002_v37 = vpop.f32.mrb[12].mxu0  ;;  %v1054_v38 = vpop.f32.mrb[12].mxu1 }
 0x239   : > { %v1003_v39 = vadd.f32 %v2100_v31, %v1002_v37  ;;  %v1055_v40 = vadd.f32 %v2101_v34, %v1054_v38  ;;  %v2259_v41 = vpop.f32.mrb[13].mxu0  ;;  %v2267_v42 = vpop.f32.mrb[13].mxu1  ;;  %vm1515_vm5 = vcmp.eq.s32.totalorder %v1514_v27, 1 }
 0x23a   : > { %v1005_v45 = vpop.f32.mrb[14].mxu0  ;;  %v1057_v46 = vpop.f32.mrb[14].mxu1  ;;  %vm2786_vm7 = vmor %vm1515_vm5, %vm1523_vm6 }
 0x23b   : > { %v1322_v49 = vpack.c.bf16 %v1003_v39, %v1003_v39  ;;  %v1323_v50 = vpack.c.bf16 %v1055_v40, %v1055_v40  ;;  %v2260_v51 = vpop.f32.mrb[15].mxu0  ;;  %v2268_v52 = vpop.f32.mrb[15].mxu1 }
 0x23d   : > { %v1421_v53 = vsel %vm1324_vm2, %v1322_v49, 0  ;;  %v1467_v54 = vsel %vm1324_vm2, %v1323_v50, 0  ;;  %2304 = vmatmul.mubr.msk.bf16.vlgmr.msra.gmra.mrb[24].mxu0 %vm1324_vm2, %v1316_v43  ;;  %2310 = vmatmul.mubr.msk.bf16.vlgmr.msra.gmra.mrb[24].mxu1 %vm1324_vm2, %v1317_v44 }
 0x23e   : > { %2314 = vmatpush3.bf16.xpose.msra.mxu0 %v1421_v53  ;;  %2320 = vmatpush3.bf16.xpose.msra.mxu1 %v1467_v54 }
 0x23f   : > { %2315 = vmatprep.mubr.msk.bf16.mxu0 %vm2469_vm1, %v2468_v16  ;;  %2321 = vmatprep.mubr.msk.bf16.mxu1 %vm2469_vm1, %v2468_v16 }
 0x240   : > { %v1150_v59 = vpop.f32.mrb[16].mxu0  ;;  %v1202_v60 = vpop.f32.mrb[16].mxu1  ;;  %2325 = vmatprep.subr.bf16.mxu0 %v2468_v16  ;;  %2331 = vmatprep.subr.bf16.mxu1 %v2468_v16 }
 0x241   : > { %v1151_v61 = vadd.f32 %v2114_v55, %v1150_v59  ;;  %v1203_v62 = vadd.f32 %v2115_v56, %v1202_v60  ;;  %v2275_v63 = vpop.f32.mrb[17].mxu0  ;;  %v2283_v1 = vpop.f32.mrb[17].mxu1 }
 0x242   : > { %v1153_v2 = vpop.f32.mrb[18].mxu0  ;;  %v1205_v3 = vpop.f32.mrb[18].mxu1 }
 0x243   : > { %v1579_v6 = vpack.c.bf16 %v1151_v61, %v1151_v61  ;;  %v1580_v7 = vpack.c.bf16 %v1203_v62, %v1203_v62  ;;  %v2276_v8 = vpop.f32.mrb[19].mxu0  ;;  %v2284_v9 = vpop.f32.mrb[19].mxu1 }
 0x245   : > { %v1588_v10 = vsel %vm1586_vm3, %v1579_v6, 0  ;;  %v1634_v11 = vsel %vm1586_vm3, %v1580_v7, 0  ;;  %2316 = vmatmul.mubr.msk.bf16.vlgmr.msra.gmra.mrb[28].mxu0 %vm1324_vm2, %v1318_v4  ;;  %2322 = vmatmul.mubr.msk.bf16.vlgmr.msra.gmra.mrb[28].mxu1 %vm1324_vm2, %v1319_v5 }
 0x246   : > { %2326 = vmatpush3.bf16.msra.mxu0 %v1588_v10  ;;  %2332 = vmatpush3.bf16.msra.mxu1 %v1634_v11 }
 0x247   : > { %2327 = vmatprep.mubr.msk.bf16.mxu0 %vm2469_vm1, %v2468_v16  ;;  %2333 = vmatprep.mubr.msk.bf16.mxu1 %vm2469_vm1, %v2468_v16 }
 0x248   : > { %v2776_v12 = vpop.f32.mrb[20].mxu0  ;;  %v2778_v13 = vpop.f32.mrb[20].mxu1  ;;  %2337 = vmatprep.subr.bf16.mxu0 %v2468_v16  ;;  %2343 = vmatprep.subr.bf16.mxu1 %v2468_v16 }
 0x249   : > { %v2291_v14 = vpop.f32.mrb[21].mxu0  ;;  %v2299_v15 = vpop.f32.mrb[21].mxu1 }
 0x24a   : > { %v1257_v17 = vpop.f32.mrb[22].mxu0  ;;  %v1309_v18 = vpop.f32.mrb[22].mxu1  ;;  %v2117_v15 = vld [vmem:[%s2888_s10 + $0x3] ss:$0 sm:$0xff] }
 0x24b   : > { %v2292_v19 = vpop.f32.mrb[23].mxu0  ;;  %v2300_v20 = vpop.f32.mrb[23].mxu1  ;;  %v2116_v17 = vld [vmem:[%s2888_s10 + $0x2] ss:$0 sm:$0xff]  ;;  %v1307_v18 = vadd.f32 %v2117_v15, %v2778_v13 }
 0x24c   : > { %v1255_v20 = vadd.f32 %v2116_v17, %v2776_v12 }
 0x24d   : > { %v1582_v24 = vpack.c.bf16 %v1307_v18, %v1307_v18 }
 0x24e   : > { %v1581_v26 = vpack.c.bf16 %v1255_v20, %v1255_v20 }
 0x250   : > { %v1680_v13 = vsel %vm1586_vm3, %v1581_v26, 0 }
 0x310   : > { %v1365_v30 = vpop.f32.mrb[24].mxu0  ;;  %v1411_v31 = vpop.f32.mrb[24].mxu1 }
 0x311   : > { %v1527_v32 = vsel %vm2786_vm7, -1e+18, %v1365_v30  ;;  %v1528_v33 = vsel %vm2786_vm7, -1e+18, %v1411_v31  ;;  %v2305_v34 = vpop.f32.mrb[25].mxu0  ;;  %v2311_v35 = vpop.f32.mrb[25].mxu1 }
 0x312   : > { %v1368_v36 = vpop.f32.mrb[26].mxu0  ;;  %v1414_v37 = vpop.f32.mrb[26].mxu1  ;;  %v1534_v38 = vsel %vm1324_vm2, %v1528_v33, -inf  ;;  %v1531_v39 = vsel %vm1324_vm2, %v1527_v32, -inf  ;;  %v1726_v30 = vsel %vm1586_vm3, %v1582_v24, 0 }
 0x313   : > { %1535 = vmax.xlane.f32.xlu1 %v1534_v38  ;;  %v2312_v40 = vpop.f32.mrb[27].mxu1  ;;  %1532 = vmax.xlane.f32.xlu0 %v1531_v39  ;;  %v2306_v41 = vpop.f32.mrb[27].mxu0  ;;  %v1773_v31 = vld [vmem:[%s2889_s11 + $0x4] sm:$0xf]  ;;  %v1772_v34 = vld [vmem:[%s2889_s11] sm:$0xf] }
 0x314   : > { %v1826_v37 = vsel %vm1586_vm3, %v1773_v31, 0  ;;  %v1780_v39 = vsel %vm1586_vm3, %v1772_v34, 0  ;;  %v1775_v40 = vld [vmem:[%s2889_s11 + $0xc] sm:$0xf]  ;;  %v1774_v41 = vld [vmem:[%s2889_s11 + $0x8] sm:$0xf] }
 0x315   : > { %v2142_v24 = vld [vmem:[%s2890_s12] ss:$0 sm:$0xff] }
 0x318   : > { %v1457_v42 = vpop.f32.mrb[28].mxu0  ;;  %v1503_v43 = vpop.f32.mrb[28].mxu1 }
 0x319   : > { %v1529_v44 = vsel %vm2786_vm7, -1e+18, %v1457_v42  ;;  %v1530_v45 = vsel %vm2786_vm7, -1e+18, %v1503_v43  ;;  %v2317_v46 = vpop.f32.mrb[29].mxu0  ;;  %v2323_v47 = vpop.f32.mrb[29].mxu1 }
 0x31a   : > { %v1460_v48 = vpop.f32.mrb[30].mxu0  ;;  %v1506_v49 = vpop.f32.mrb[30].mxu1  ;;  %v1540_v50 = vsel %vm1324_vm2, %v1530_v45, -inf  ;;  %v1537_v51 = vsel %vm1324_vm2, %v1529_v44, -inf  ;;  %v1918_v46 = vsel %vm1586_vm3, %v1775_v40, 0 }
 0x31b   : > { %1541 = vmax.xlane.f32.xlu1 %v1540_v50  ;;  %v2324_v52 = vpop.f32.mrb[31].mxu1  ;;  %1538 = vmax.xlane.f32.xlu0 %v1537_v51  ;;  %v2318_v53 = vpop.f32.mrb[31].mxu0  ;;  %v1872_v50 = vsel %vm1586_vm3, %v1774_v41, 0 }
 0x3a0   : > { %v1536_v54 = vpop.xlane.xlu1 %1535  ;;  %v1533_v55 = vpop.xlane.xlu0 %1532 }
 0x3a1   : > { %v1544_v56 = vsub.f32 %v1528_v33, %v1536_v54  ;;  %v1543_v57 = vsub.f32 %v1527_v32, %v1533_v55 }
 0x3a3   : > { %v1549_v58 = vmul.f32 1.442695, %v1544_v56  ;;  %v1547_v59 = vmul.f32 1.442695, %v1543_v57 }
 0x3a5   : > { %2428 = vpow2.f32 %v1549_v58 }
 0x3a6   : > { %2430 = vpow2.f32 %v1547_v59 }
 0x3a8   : > { %v1542_v60 = vpop.xlane.xlu1 %1541  ;;  %v1539_v61 = vpop.xlane.xlu0 %1538 }
 0x3a9   : > { %v1546_v62 = vsub.f32 %v1530_v45, %v1542_v60  ;;  %v1545_v63 = vsub.f32 %v1529_v44, %v1539_v61 }
 0x3ab   : > { %v1553_v1 = vmul.f32 1.442695, %v1546_v62  ;;  %v1551_v2 = vmul.f32 1.442695, %v1545_v63 }
 0x3ad   : > { %2432 = vpow2.f32 %v1553_v1 }
 0x3ae   : > { %2434 = vpow2.f32 %v1551_v2 }
 0x3af   : > { %v2429_v3 = vpop.eup %2428 }
 0x3b0   : > { %v2431_v4 = vpop.eup %2430  ;;  %v1558_v5 = vsel %vm1324_vm2, %v2429_v3, 0.0 }
 0x3b1   : > { %1559 = vadd.xlane.f32.xlu1 %v1558_v5  ;;  %v1555_v6 = vsel %vm1324_vm2, %v2431_v4, 0.0 }
 0x3b2   : > { %1556 = vadd.xlane.f32.xlu0 %v1555_v6 }
 0x3b7   : > { %v2433_v7 = vpop.eup %2432 }
 0x3b8   : > { %v2435_v8 = vpop.eup %2434  ;;  %v1564_v9 = vsel %vm1324_vm2, %v2433_v7, 0.0 }
 0x3b9   : > { %1565 = vadd.xlane.f32.xlu1 %v1564_v9  ;;  %v1561_v10 = vsel %vm1324_vm2, %v2435_v8, 0.0 }
 0x3ba   : > { %1562 = vadd.xlane.f32.xlu0 %v1561_v10 }
 0x43e   : > { %v1560_v11 = vpop.xlane.xlu1 %1559 }
 0x43f   : > { %2436 = vrcp.f32 %v1560_v11  ;;  %v1557_v14 = vpop.xlane.xlu0 %1556 }
 0x440   : > { %2438 = vrcp.f32 %v1557_v14 }
 0x446   : > { %v1566_v19 = vpop.xlane.xlu1 %1565 }
 0x447   : > { %2440 = vrcp.f32 %v1566_v19  ;;  %v1563_v21 = vpop.xlane.xlu0 %1562 }
 0x448   : > { %2442 = vrcp.f32 %v1563_v21 }
 0x449   : > { %v2437_v22 = vpop.eup %2436 }
 0x44a   : > { %v2439_v23 = vpop.eup %2438  ;;  %v1572_v25 = vmul.f32 %v2437_v22, %v2429_v3 }
 0x44b   : > { %v1571_v27 = vmul.f32 %v2439_v23, %v2431_v4 }
 0x44c   : > { %v1576_v28 = vpack.c.bf16 %v1572_v25, %v1572_v25 }
 0x44d   : > { %v1575_v29 = vpack.c.bf16 %v1571_v27, %v1571_v27 }
 0x44e   : > { %2334 = vmatmul.mubr.msk.bf16.vlgmr.msra.gmra.mrb[32].mxu1 %vm1324_vm2, %v1576_v28 }
 0x44f   : > { %2328 = vmatmul.mubr.msk.bf16.vlgmr.msra.gmra.mrb[32].mxu0 %vm1324_vm2, %v1575_v29  ;;  %2344 = vmatpush3.bf16.msra.mxu1 %v1726_v30 }
 0x450   : > { %2338 = vmatpush3.bf16.msra.mxu0 %v1680_v13  ;;  %2339 = vmatprep.mubr.msk.bf16.mxu0 %vm2469_vm1, %v2468_v16 }
 0x451   : > { %v2441_v12 = vpop.eup %2440  ;;  %2345 = vmatprep.mubr.msk.bf16.mxu1 %vm2469_vm1, %v2468_v16  ;;  %2349 = vmatprep.subr.bf16.mxu0 %v2468_v16 }
 0x452   : > { %v2443_v32 = vpop.eup %2442  ;;  %v1574_v33 = vmul.f32 %v2441_v12, %v2433_v7  ;;  %2355 = vmatprep.subr.bf16.mxu1 %v2468_v16 }
 0x453   : > { %v1573_v35 = vmul.f32 %v2443_v32, %v2435_v8 }
 0x454   : > { %v1578_v36 = vpack.c.bf16 %v1574_v33, %v1574_v33 }
 0x455   : > { %v1577_v38 = vpack.c.bf16 %v1573_v35, %v1573_v35 }
 0x456   : > { %2346 = vmatmul.mubr.msk.bf16.vlgmr.msra.gmra.mrb[36].mxu1 %vm1324_vm2, %v1578_v36 }
 0x457   : > { %2340 = vmatmul.mubr.msk.bf16.vlgmr.msra.gmra.mrb[36].mxu0 %vm1324_vm2, %v1577_v38  ;;  %2356 = vmatpush3.bf16.msra.mxu1 %v1826_v37 }
 0x458   : > { %2350 = vmatpush3.bf16.msra.mxu0 %v1780_v39  ;;  %2351 = vmatprep.mubr.msk.bf16.mxu0 %vm2469_vm1, %v2468_v16 }
 0x459   : > { %2357 = vmatprep.mubr.msk.bf16.mxu1 %vm2469_vm1, %v2468_v16  ;;  %2361 = vmatprep.subr.bf16.mxu0 %v2468_v16 }
 0x45a   : > { %2367 = vmatprep.subr.bf16.mxu1 %v2468_v16 }
 0x521   : > { %v1670_v42 = vpop.f32.mrb[32].mxu1 }
 0x522   : > { %v1624_v43 = vpop.f32.mrb[32].mxu0  ;;  %v1769_v44 = vpack.c.bf16 %v1670_v42, %v1670_v42  ;;  %v2335_v45 = vpop.f32.mrb[33].mxu1 }
 0x523   : > { %v1768_v47 = vpack.c.bf16 %v1624_v43, %v1624_v43  ;;  %v2329_v48 = vpop.f32.mrb[33].mxu0  ;;  %v1673_v49 = vpop.f32.mrb[34].mxu1 }
 0x524   : > { %v1627_v51 = vpop.f32.mrb[34].mxu0  ;;  %v2336_v52 = vpop.f32.mrb[35].mxu1  ;;  %2358 = vmatmul.mubr.msk.bf16.vlgmr.msra.gmra.mrb[40].mxu1 %vm1324_vm2, %v1769_v44 }
 0x525   : > { %v2330_v53 = vpop.f32.mrb[35].mxu0  ;;  %2352 = vmatmul.mubr.msk.bf16.vlgmr.msra.gmra.mrb[40].mxu0 %vm1324_vm2, %v1768_v47  ;;  %2368 = vmatpush3.bf16.msra.mxu1 %v1918_v46 }
 0x526   : > { %2362 = vmatpush3.bf16.msra.mxu0 %v1872_v50  ;;  %2363 = vmatprep.mubr.msk.bf16.mxu0 %vm2469_vm1, %v2468_v16 }
 0x527   : > { %2369 = vmatprep.mubr.msk.bf16.mxu1 %vm2469_vm1, %v2468_v16 }
 0x529   : > { %v1762_v54 = vpop.f32.mrb[36].mxu1 }
 0x52a   : > { %v1716_v55 = vpop.f32.mrb[36].mxu0  ;;  %v1771_v56 = vpack.c.bf16 %v1762_v54, %v1762_v54  ;;  %v2347_v57 = vpop.f32.mrb[37].mxu1 }
 0x52b   : > { %v1770_v58 = vpack.c.bf16 %v1716_v55, %v1716_v55  ;;  %v2341_v59 = vpop.f32.mrb[37].mxu0  ;;  %v1765_v60 = vpop.f32.mrb[38].mxu1 }
 0x52c   : > { %v1719_v61 = vpop.f32.mrb[38].mxu0  ;;  %v2348_v62 = vpop.f32.mrb[39].mxu1  ;;  %2370 = vmatmul.mubr.msk.bf16.vlgmr.msra.gmra.mrb[44].mxu1 %vm1324_vm2, %v1771_v56 }
 0x52d   : > { %v2342_v63 = vpop.f32.mrb[39].mxu0  ;;  %2364 = vmatmul.mubr.msk.bf16.vlgmr.msra.gmra.mrb[44].mxu0 %vm1324_vm2, %v1770_v58 }
 0x5f7   : > { %v1862_v1 = vpop.f32.mrb[40].mxu1 }
 0x5f8   : > { %v1816_v2 = vpop.f32.mrb[40].mxu0  ;;  %v1961_v3 = vsel %vm504_vm0, %v1862_v1, 0.0  ;;  %v2359_v4 = vpop.f32.mrb[41].mxu1 }
 0x5f9   : > { %v1960_v16 = vsel %vm504_vm0, %v1816_v2, 0.0  ;;  %v2353_v5 = vpop.f32.mrb[41].mxu0  ;;  %v1865_v6 = vpop.f32.mrb[42].mxu1 }
 0x5fa   : > { %v1962_v7 = vadd.f32 %v1961_v3, %v1960_v16  ;;  %v1819_v8 = vpop.f32.mrb[42].mxu0  ;;  %v2360_v9 = vpop.f32.mrb[43].mxu1 }
 0x5fb   : > { %v2354_v10 = vpop.f32.mrb[43].mxu0 }
 0x5ff   : > { %v1954_v11 = vpop.f32.mrb[44].mxu1 }
 0x600   : > { %v1908_v14 = vpop.f32.mrb[44].mxu0  ;;  %v2371_v15 = vpop.f32.mrb[45].mxu1  ;;  %v1965_v23 = vsel %vm504_vm0, %v1954_v11, 0.0 }
 0x601   : > { %v1963_v17 = vsel %vm504_vm0, %v1908_v14, 0.0  ;;  %v2365_v18 = vpop.f32.mrb[45].mxu0  ;;  %v1957_v19 = vpop.f32.mrb[46].mxu1 }
 0x602   : > { %v1964_v20 = vadd.f32 %v1963_v17, %v1962_v7  ;;  %v1911_v21 = vpop.f32.mrb[46].mxu0  ;;  %v2372_v22 = vpop.f32.mrb[47].mxu1 }
 0x603   : > { %v2366_v25 = vpop.f32.mrb[47].mxu0 }
 0x604   : > { %v1966_v26 = vadd.f32 %v1965_v23, %v1964_v20 }
 0x606   : > { %v1974_v27 = vadd.f32 %v2142_v24, %v1966_v26 }
 0x608   : > { %v1975_v28 = vadd.f32 %v1974_v27, %v2568_v0 }
 0x60a   : > { %1976 = vst.msk [vmem:[%s497_s24] sm:$0xff] %vm504_vm0, %v1975_v28 }
 0x60b PF: > { %s23_s27 = sadd.s32 1, %s2466_s27   ;;  %s2894_s25 = smov %s2462_s26 }
 0x60c   : > { %p20_p5 = scmp.ge.s32.totalorder %s23_s27, 4   ;;  %s2895_s26 = smov %s2897_s28 }
 0x60e   :  { %22 = sbr.rel (!%p20_p5) target bundleno = 2 (0x2), region = 108 }

// kernel: decoder_forward.8
= control target key start
LH: loop header
LB: loop body
LE: loop exit
PB: predicated region body
PF: predicated region fallthrough
CT: control target
= control target key end

     0   :  { %s2513_s25 = smov 0   ;;  %s2515_s26 = smov 0   ;;  %s2840_s0 = inlined_call_operand.vmem [shape: f32[2,8,32], index: 0, kind: input, shape index: {}, may-alias: {0,13}]   ;;  %s2841_s1 = inlined_call_operand.vmem [shape: f32[2,8,32], index: 1, kind: input, shape index: {}]   ;;  %s2842_s2 = inlined_call_operand.vmem [shape: s32[2,1,8], index: 2, kind: input, shape index: {}]   ;;  %s2843_s3 = inlined_call_operand.vmem [shape: f32[1,32], index: 3, kind: input, shape index: {}]   ;;  %s2844_s4 = inlined_call_operand.vmem [shape: f32[1,32], index: 4, kind: input, shape index: {}]   ;;  %s2845_s5 = inlined_call_operand.vmem [shape: bf16[4,32,8], index: 5, kind: input, shape index: {}]   ;;  %s2846_s6 = inlined_call_operand.vmem [shape: f32[4,1,8], index: 6, kind: input, shape index: {}]   ;;  %s2847_s7 = inlined_call_operand.vmem [shape: bf16[4,32,8], index: 7, kind: input, shape index: {}]   ;;  %s2848_s8 = inlined_call_operand.vmem [shape: f32[4,1,8], index: 8, kind: input, shape index: {}]   ;;  %s2849_s9 = inlined_call_operand.vmem [shape: bf16[4,32,8], index: 9, kind: input, shape index: {}]   ;;  %s2850_s10 = inlined_call_operand.vmem [shape: f32[4,1,8], index: 10, kind: input, shape index: {}]   ;;  %s2851_s11 = inlined_call_operand.vmem [shape: bf16[4,8,32], index: 11, kind: input, shape index: {}]   ;;  %s2852_s12 = inlined_call_operand.vmem [shape: f32[1,32], index: 12, kind: input, shape index: {}]   ;;  %s2853_s13 = inlined_call_operand.vmem [shape: f32[2,8,32], index: 13, kind: output, shape index: {}, may-alias: {0,13}]  }
   0x1   :  { %s2517_s27 = smov 0  }
   0x2 LB: > { %s35_s28 = sadd.s32 1, %s2434_s26  ;;  %p2050_p0 = scmp.ge.s32.totalorder %s2438_s27, 1  ;;  %s2438_s27 = sphi %s2517_s27, %s23_s27   ;;  %s2434_s26 = sphi %s2515_s26, %s2855_s26   ;;  %s2430_s25 = sphi %s2513_s25, %s2854_s25  }
   0x3   : > { %p37_p1 = scmp.ge.s32.totalorder %s35_s28, 2  ;;  %p422_p2 = scmp.lt.s32.totalorder %s2438_s27, 3 }
   0x5   : > { %s2857_s28 = smov (%p37_p1, %s35_s28), 0  ;;  %p423_p3 = pnand %p2050_p0, %p422_p2 }
   0x6   : > { %p477_p4 = scmp.lt.s32.totalorder (!%p423_p3), %s2430_s25, 1  ;;  %vm504_vm0 = vcmask (!%p423_p3), 261120   ;;  %v2374_v7 = vld [vmem:[%s2845_s5] sm:$0xff] (!%p423_p3)   ;;  %v2375_v8 = vld [vmem:[%s2845_s5 + $0x10] sm:$0xff] (!%p423_p3)   ;;  %v2440_v9 = vmov (!%p423_p3), 0.0   ;;  %v2376_v10 = vld [vmem:[%s2845_s5 + $0x8] sm:$0xff] (!%p423_p3)  }
   0x7   : > { %426 = sbr.rel (%p423_p3) target bundleno = 1548 (0x60c), region = 72  ;;  %2179 = vmatprep.subr.bf16.mxu0 (!%p423_p3), %v2440_v9  ;;  %2187 = vmatprep.subr.bf16.mxu1 (!%p423_p3), %v2440_v9  ;;  %v2377_v11 = vld [vmem:[%s2845_s5 + $0x18] sm:$0xff] (!%p423_p3)   ;;  %vm2441_vm1 = vmmov (!%p423_p3), 0   ;;  %v2054_v16 = vld [vmem:[%s2843_s3] ss:$0 sm:$0xff] (!%p423_p3)  ;;  %v2379_v22 = vld [vmem:[%s2845_s5 + $0x30] sm:$0xff] (!%p423_p3)  }
   0x8   : > { %2180 = vmatpush3.bf16.msra.mxu0 (!%p423_p3), %v2374_v7  ;;  %2188 = vmatpush3.bf16.msra.mxu1 (!%p423_p3), %v2375_v8  ;;  %v2055_v18 = vld [vmem:[%s2844_s4] ss:$0 sm:$0xff] (!%p423_p3)  ;;  %v2380_v24 = vld [vmem:[%s2845_s5 + $0x28] sm:$0xff] (!%p423_p3)   ;;  %v2381_v25 = vld [vmem:[%s2845_s5 + $0x38] sm:$0xff] (!%p423_p3)   ;;  %vm1309_vm2 = vcmask (!%p423_p3), 64512   ;;  %vm1560_vm3 = vcmask (!%p423_p3), 1043456  }
   0x9   : > { %2181 = vmatprep.subr.bf16.mxu0 (!%p423_p3), %v2440_v9  ;;  %2189 = vmatprep.subr.bf16.mxu1 (!%p423_p3), %v2440_v9  ;;  %v2378_v21 = vld [vmem:[%s2845_s5 + $0x20] sm:$0xff] (!%p423_p3)   ;;  %v2383_v27 = vld [vmem:[%s2847_s7 + $0x10] sm:$0xff] (!%p423_p3)   ;;  %v2384_v29 = vld [vmem:[%s2847_s7 + $0x8] sm:$0xff] (!%p423_p3)  }
   0xa   : > { %2183 = vmatprep.mubr.msk.bf16.mxu0 (!%p423_p3), %vm2441_vm1, %v2440_v9  ;;  %2191 = vmatprep.mubr.msk.bf16.mxu1 (!%p423_p3), %vm2441_vm1, %v2440_v9  ;;  %v2382_v26 = vld [vmem:[%s2847_s7] sm:$0xff] (!%p423_p3)   ;;  %v2385_v30 = vld [vmem:[%s2847_s7 + $0x18] sm:$0xff] (!%p423_p3)   ;;  %v2387_v33 = vld [vmem:[%s2847_s7 + $0x30] sm:$0xff] (!%p423_p3)  }
   0xb   : > { %v2386_v32 = vld [vmem:[%s2847_s7 + $0x20] sm:$0xff] (!%p423_p3)   ;;  %v2388_v34 = vld [vmem:[%s2847_s7 + $0x28] sm:$0xff] (!%p423_p3)   ;;  %v2389_v35 = vld [vmem:[%s2847_s7 + $0x38] sm:$0xff] (!%p423_p3)  }
   0xc   : > { %2182 = vmatpush3.bf16.msra.mxu0 (!%p423_p3), %v2376_v10  ;;  %2190 = vmatpush3.bf16.msra.mxu1 (!%p423_p3), %v2377_v11  ;;  %v2390_v36 = vld [vmem:[%s2849_s9] sm:$0xff] (!%p423_p3)   ;;  %v2391_v37 = vld [vmem:[%s2849_s9 + $0x10] sm:$0xff] (!%p423_p3)   ;;  %v2392_v38 = vld [vmem:[%s2849_s9 + $0x8] sm:$0xff] (!%p423_p3)  }
   0xd   : > { %2195 = vmatprep.subr.bf16.mxu0 (!%p423_p3), %v2440_v9  ;;  %2203 = vmatprep.subr.bf16.mxu1 (!%p423_p3), %v2440_v9  ;;  %v2393_v39 = vld [vmem:[%s2849_s9 + $0x18] sm:$0xff] (!%p423_p3)   ;;  %v2394_v40 = vld [vmem:[%s2849_s9 + $0x20] sm:$0xff] (!%p423_p3)   ;;  %v2395_v41 = vld [vmem:[%s2849_s9 + $0x30] sm:$0xff] (!%p423_p3)  }
   0xe   : > { %s2859_s25 = smov (!%p477_p4, %s2430_s25), 1  ;;  %v2396_v42 = vld [vmem:[%s2849_s9 + $0x28] sm:$0xff]   ;;  %v2397_v43 = vld [vmem:[%s2849_s9 + $0x38] sm:$0xff]   ;;  %v2072_v60 = vld [vmem:[%s2848_s8] ss:$0 sm:$0xff] }
   0xf   : > { %s2534_s29 = sshll.u32 %s2859_s25, 3  ;;  %v2073_v61 = vld [vmem:[%s2848_s8 + $0x1] ss:$0 sm:$0xff]  ;;  %v2056_v62 = vld [vmem:[%s2846_s6] ss:$0 sm:$0xff]  ;;  %s490_s21 = scalar_lea.vmem %s2842_s2, %s2859_s25 }
  0x10   : > { %s483_s15 = scalar_lea.vmem %s2840_s0, %s2534_s29  ;;  %s487_s18 = scalar_lea.vmem %s2841_s1, %s2534_s29  ;;  %v2057_v63 = vld [vmem:[%s2846_s6 + $0x1] ss:$0 sm:$0xff] }
  0x11   : > { %v2540_v0 = vld [vmem:[%s483_s15] sm:$0xff]  ;;  %s497_s24 = scalar_lea.vmem %s2853_s13, %s2534_s29 }
  0x12   : > { %v505_v1 = vsel %vm504_vm0, %v2540_v0, 0.0  ;;  %v500_v28 = vld [vmem:[%s487_s18] sm:$0xff] }
  0x13   : > { %506 = vadd.xlane.f32.xlu0 %v505_v1  ;;  %v534_v31 = vpack.c.bf16 %v500_v28, %v500_v28 }
  0xa0   : > { %v507_v2 = vpop.xlane.xlu0 %506 }
  0xa1   : > { %v509_v3 = vmul.f32 0.03125, %v507_v2 }
  0xa3   : > { %v510_v4 = vsub.f32 %v2540_v0, %v509_v3 }
  0xa5   : > { %v511_v5 = vmul.f32 %v510_v4, %v510_v4 }
  0xa7   : > { %v512_v6 = vsel %vm504_vm0, %v511_v5, 0.0 }
  0xa8   : > { %513 = vadd.xlane.f32.xlu0 %v512_v6 }
 0x135   : > { %v514_v12 = vpop.xlane.xlu0 %513 }
 0x136   : > { %v515_v13 = vmul.f32 0.03125, %v514_v12 }
 0x138   : > { %v516_v14 = vadd.f32 1e-05, %v515_v13 }
 0x13a   : > { %2398 = vrsqrt.f32 %v516_v14 }
 0x144   : > { %v2399_v15 = vpop.eup %2398 }
 0x145   : > { %v518_v17 = vmul.f32 %v2399_v15, %v510_v4 }
 0x147   : > { %v525_v19 = vmul.f32 %v2054_v16, %v518_v17 }
 0x149   : > { %v532_v20 = vadd.f32 %v2055_v18, %v525_v19  ;;  %v2074_v18 = vld [vmem:[%s2848_s8 + $0x2] ss:$0 sm:$0xff] }
 0x14b   : > { %v533_v23 = vpack.c.bf16 %v532_v20, %v532_v20 }
 0x14d   : > { %2184 = vmatmul.mubr.msk.bf16.vlgmr.msra.gmra.mrb[0].mxu0 %vm504_vm0, %v533_v23  ;;  %2192 = vmatmul.mubr.msk.bf16.vlgmr.msra.gmra.mrb[0].mxu1 %vm504_vm0, %v533_v23 }
 0x14e   : > { %2196 = vmatpush3.bf16.msra.mxu0 %v2378_v21  ;;  %2204 = vmatpush3.bf16.msra.mxu1 %v2379_v22  ;;  %v2075_v21 = vld [vmem:[%s2848_s8 + $0x3] ss:$0 sm:$0xff]  ;;  %v2058_v22 = vld [vmem:[%s2846_s6 + $0x2] ss:$0 sm:$0xff] }
 0x14f   : > { %2197 = vmatprep.subr.bf16.mxu0 %v2440_v9  ;;  %2205 = vmatprep.subr.bf16.mxu1 %v2440_v9 }
 0x150   : > { %2199 = vmatprep.mubr.msk.bf16.mxu0 %vm2441_vm1, %v2440_v9  ;;  %2207 = vmatprep.mubr.msk.bf16.mxu1 %vm2441_vm1, %v2440_v9 }
 0x152   : > { %2198 = vmatpush3.bf16.msra.mxu0 %v2380_v24  ;;  %2206 = vmatpush3.bf16.msra.mxu1 %v2381_v25 }
 0x153   : > { %2211 = vmatprep.subr.bf16.mxu0 %v2440_v9  ;;  %2219 = vmatprep.subr.bf16.mxu1 %v2440_v9 }
 0x155   : > { %2200 = vmatmul.mubr.msk.bf16.vlgmr.msra.gmra.mrb[4].mxu0 %vm504_vm0, %v533_v23  ;;  %2208 = vmatmul.mubr.msk.bf16.vlgmr.msra.gmra.mrb[4].mxu1 %vm504_vm0, %v533_v23  ;;  %v2059_v23 = vld [vmem:[%s2846_s6 + $0x3] ss:$0 sm:$0xff] }
 0x156   : > { %2212 = vmatpush3.bf16.msra.mxu0 %v2382_v26  ;;  %2220 = vmatpush3.bf16.msra.mxu1 %v2383_v27 }
 0x157   : > { %2213 = vmatprep.subr.bf16.mxu0 %v2440_v9  ;;  %2221 = vmatprep.subr.bf16.mxu1 %v2440_v9 }
 0x158   : > { %2215 = vmatprep.mubr.msk.bf16.mxu0 %vm2441_vm1, %v2440_v9  ;;  %2223 = vmatprep.mubr.msk.bf16.mxu1 %vm2441_vm1, %v2440_v9 }
 0x15a   : > { %2214 = vmatpush3.bf16.msra.mxu0 %v2384_v29  ;;  %2222 = vmatpush3.bf16.msra.mxu1 %v2385_v30 }
 0x15b   : > { %2227 = vmatprep.subr.bf16.mxu0 %v2440_v9  ;;  %2235 = vmatprep.subr.bf16.mxu1 %v2440_v9 }
 0x15d   : > { %2216 = vmatmul.mubr.msk.bf16.vlgmr.msra.gmra.mrb[8].mxu0 %vm504_vm0, %v534_v31  ;;  %2224 = vmatmul.mubr.msk.bf16.vlgmr.msra.gmra.mrb[8].mxu1 %vm504_vm0, %v534_v31 }
 0x15e   : > { %2228 = vmatpush3.bf16.msra.mxu0 %v2386_v32  ;;  %2236 = vmatpush3.bf16.msra.mxu1 %v2387_v33 }
 0x15f   : > { %2229 = vmatprep.subr.bf16.mxu0 %v2440_v9  ;;  %2237 = vmatprep.subr.bf16.mxu1 %v2440_v9 }
 0x160   : > { %2231 = vmatprep.mubr.msk.bf16.mxu0 %vm2441_vm1, %v2440_v9  ;;  %2239 = vmatprep.mubr.msk.bf16.mxu1 %vm2441_vm1, %v2440_v9 }
 0x162   : > { %2230 = vmatpush3.bf16.msra.mxu0 %v2388_v34  ;;  %2238 = vmatpush3.bf16.msra.mxu1 %v2389_v35 }
 0x163   : > { %2243 = vmatprep.subr.bf16.mxu0 %v2440_v9  ;;  %2251 = vmatprep.subr.bf16.mxu1 %v2440_v9 }
 0x165   : > { %2232 = vmatmul.mubr.msk.bf16.vlgmr.msra.gmra.mrb[12].mxu0 %vm504_vm0, %v534_v31  ;;  %2240 = vmatmul.mubr.msk.bf16.vlgmr.msra.gmra.mrb[12].mxu1 %vm504_vm0, %v534_v31 }
 0x166   : > { %2244 = vmatpush3.bf16.msra.mxu0 %v2390_v36  ;;  %2247 = vmatprep.mubr.msk.bf16.mxu0 %vm2441_vm1, %v2440_v9 }
 0x167   : > { %2245 = vmatprep.subr.bf16.mxu0 %v2440_v9  ;;  %2255 = vmatprep.mubr.msk.bf16.mxu1 %vm2441_vm1, %v2440_v9 }
 0x168   : > { %2252 = vmatpush3.bf16.msra.mxu1 %v2391_v37 }
 0x169   : > { %2253 = vmatprep.subr.bf16.mxu1 %v2440_v9 }
 0x16a   : > { %2246 = vmatpush3.bf16.msra.mxu0 %v2392_v38 }
 0x16b   : > { %2259 = vmatprep.subr.bf16.mxu0 %v2440_v9 }
 0x16c   : > { %2254 = vmatpush3.bf16.msra.mxu1 %v2393_v39 }
 0x16d   : > { %2248 = vmatmul.mubr.msk.bf16.vlgmr.msra.gmra.mrb[16].mxu0 %vm504_vm0, %v534_v31  ;;  %2267 = vmatprep.subr.bf16.mxu1 %v2440_v9 }
 0x16e   : > { %2263 = vmatprep.mubr.msk.bf16.mxu0 %vm2441_vm1, %v2440_v9  ;;  %2260 = vmatpush3.bf16.msra.mxu0 %v2394_v40 }
 0x16f   : > { %2256 = vmatmul.mubr.msk.bf16.vlgmr.msra.gmra.mrb[16].mxu1 %vm504_vm0, %v534_v31  ;;  %2261 = vmatprep.subr.bf16.mxu0 %v2440_v9 }
 0x170   : > { %2268 = vmatpush3.bf16.msra.mxu1 %v2395_v41  ;;  %2271 = vmatprep.mubr.msk.bf16.mxu1 %vm2441_vm1, %v2440_v9 }
 0x171   : > { %2269 = vmatprep.subr.bf16.mxu1 %v2440_v9 }
 0x172   : > { %2262 = vmatpush3.bf16.msra.mxu0 %v2396_v42 }
 0x173   : > { %2275 = vmatprep.subr.bf16.mxu0 %v2440_v9 }
 0x174   : > { %2270 = vmatpush3.bf16.msra.mxu1 %v2397_v43 }
 0x175   : > { %2281 = vmatprep.subr.bf16.mxu1 %v2440_v9  ;;  %2264 = vmatmul.mubr.msk.bf16.vlgmr.msra.gmra.mrb[20].mxu0 %vm504_vm0, %v534_v31 }
 0x176   : > { %2277 = vmatprep.mubr.msk.bf16.mxu0 %vm2441_vm1, %v2440_v9 }
 0x177   : > { %2272 = vmatmul.mubr.msk.bf16.vlgmr.msra.gmra.mrb[20].mxu1 %vm504_vm0, %v534_v31 }
 0x178   : > { %2283 = vmatprep.mubr.msk.bf16.mxu1 %vm2441_vm1, %v2440_v9 }
 0x220   : > { %v628_v44 = vpop.f32.mrb[0].mxu0  ;;  %v680_v45 = vpop.f32.mrb[0].mxu1 }
 0x221   : > { %v2185_v46 = vpop.f32.mrb[1].mxu0  ;;  %v2193_v47 = vpop.f32.mrb[1].mxu1  ;;  %v629_v7 = vadd.f32 %v2056_v62, %v628_v44  ;;  %v681_v8 = vadd.f32 %v2057_v63, %v680_v45 }
 0x222   : > { %v631_v48 = vpop.f32.mrb[2].mxu0  ;;  %v683_v49 = vpop.f32.mrb[2].mxu1  ;;  %v2088_v46 = vld [vmem:[%s2850_s10] ss:$0 sm:$0xff] }
 0x223   : > { %v2186_v50 = vpop.f32.mrb[3].mxu0  ;;  %v2194_v51 = vpop.f32.mrb[3].mxu1  ;;  %v1297_v19 = vmul.f32 0.35355338, %v629_v7  ;;  %v1298_v20 = vmul.f32 0.35355338, %v681_v8  ;;  %v1496_v7 = vlaneseq }
 0x224   : > { %v2089_v48 = vld [vmem:[%s2850_s10 + $0x1] ss:$0 sm:$0xff]  ;;  %v501_v8 = vld [vmem:[%s490_s21] sm:$0x1] }
 0x225   : > { %v1301_v30 = vpack.c.bf16 %v1297_v19, %v1297_v19  ;;  %v1302_v31 = vpack.c.bf16 %v1298_v20, %v1298_v20  ;;  %vm1494_vm4 = vcmp.gt.s32.totalorder %v501_v8, 0 }
 0x228   : > { %v732_v52 = vpop.f32.mrb[4].mxu0  ;;  %v784_v53 = vpop.f32.mrb[4].mxu1 }
 0x229   : > { %v2201_v54 = vpop.f32.mrb[5].mxu0  ;;  %v2209_v55 = vpop.f32.mrb[5].mxu1  ;;  %v733_v34 = vadd.f32 %v2058_v22, %v732_v52  ;;  %v785_v35 = vadd.f32 %v2059_v23, %v784_v53 }
 0x22a   : > { %v735_v56 = vpop.f32.mrb[6].mxu0  ;;  %v787_v57 = vpop.f32.mrb[6].mxu1 }
 0x22b   : > { %v2202_v58 = vpop.f32.mrb[7].mxu0  ;;  %v2210_v59 = vpop.f32.mrb[7].mxu1  ;;  %v1299_v42 = vmul.f32 0.35355338, %v733_v34  ;;  %v1300_v43 = vmul.f32 0.35355338, %v785_v35 }
 0x22d   : > { %v1303_v44 = vpack.c.bf16 %v1299_v42, %v1299_v42  ;;  %v1304_v45 = vpack.c.bf16 %v1300_v43, %v1300_v43 }
 0x230   : > { %v883_v1 = vpop.f32.mrb[8].mxu0  ;;  %v935_v2 = vpop.f32.mrb[8].mxu1 }
 0x231   : > { %v884_v3 = vadd.f32 %v2072_v60, %v883_v1  ;;  %v936_v4 = vadd.f32 %v2073_v61, %v935_v2  ;;  %v2217_v5 = vpop.f32.mrb[9].mxu0  ;;  %v2225_v6 = vpop.f32.mrb[9].mxu1 }
 0x232   : > { %v886_v10 = vpop.f32.mrb[10].mxu0  ;;  %v938_v11 = vpop.f32.mrb[10].mxu1 }
 0x233   : > { %v1305_v12 = vpack.c.bf16 %v884_v3, %v884_v3  ;;  %v1306_v13 = vpack.c.bf16 %v936_v4, %v936_v4  ;;  %v2218_v14 = vpop.f32.mrb[11].mxu0  ;;  %v2226_v15 = vpop.f32.mrb[11].mxu1  ;;  %v1497_v10 = vshrl.u32 %v1496_v7, 7 }
 0x235   : > { %v1314_v16 = vsel %vm1309_vm2, %v1305_v12, 0  ;;  %v1360_v17 = vsel %vm1309_vm2, %v1306_v13, 0  ;;  %v1498_v11 = vsub.s32 0, %v1497_v10  ;;  %v2442_v12 = vmov 0  }
 0x236   : > { %2276 = vmatpush3.bf16.xpose.msra.mxu0 %v1314_v16  ;;  %2282 = vmatpush3.bf16.xpose.msra.mxu1 %v1360_v17  ;;  %v1495_v13 = vsel %vm1494_vm4, 1, %v2442_v12 }
 0x237   : > { %2287 = vmatprep.subr.bf16.mxu0 %v2440_v9  ;;  %2293 = vmatprep.subr.bf16.mxu1 %v2440_v9  ;;  %v1499_v14 = vrot.slane %v1495_v13, %v1498_v11 }
 0x238   : > { %v987_v24 = vpop.f32.mrb[12].mxu0  ;;  %v1039_v25 = vpop.f32.mrb[12].mxu1 }
 0x239   : > { %v988_v26 = vadd.f32 %v2074_v18, %v987_v24  ;;  %v1040_v27 = vadd.f32 %v2075_v21, %v1039_v25  ;;  %v2233_v28 = vpop.f32.mrb[13].mxu0  ;;  %v2241_v29 = vpop.f32.mrb[13].mxu1  ;;  %vm1500_vm5 = vcmp.eq.s32.totalorder %v1499_v14, 1 }
 0x23a   : > { %v990_v32 = vpop.f32.mrb[14].mxu0  ;;  %v1042_v33 = vpop.f32.mrb[14].mxu1 }
 0x23b   : > { %v1307_v36 = vpack.c.bf16 %v988_v26, %v988_v26  ;;  %v1308_v37 = vpack.c.bf16 %v1040_v27, %v1040_v27  ;;  %v2234_v38 = vpop.f32.mrb[15].mxu0  ;;  %v2242_v39 = vpop.f32.mrb[15].mxu1 }
 0x23d   : > { %v1406_v40 = vsel %vm1309_vm2, %v1307_v36, 0  ;;  %v1452_v41 = vsel %vm1309_vm2, %v1308_v37, 0  ;;  %2278 = vmatmul.mubr.msk.bf16.vlgmr.msra.gmra.mrb[24].mxu0 %vm1309_vm2, %v1301_v30  ;;  %2284 = vmatmul.mubr.msk.bf16.vlgmr.msra.gmra.mrb[24].mxu1 %vm1309_vm2, %v1302_v31 }
 0x23e   : > { %2288 = vmatpush3.bf16.xpose.msra.mxu0 %v1406_v40  ;;  %2294 = vmatpush3.bf16.xpose.msra.mxu1 %v1452_v41 }
 0x23f   : > { %2289 = vmatprep.mubr.msk.bf16.mxu0 %vm2441_vm1, %v2440_v9  ;;  %2295 = vmatprep.mubr.msk.bf16.mxu1 %vm2441_vm1, %v2440_v9 }
 0x240   : > { %2299 = vmatprep.subr.bf16.mxu0 %v2440_v9  ;;  %2305 = vmatprep.subr.bf16.mxu1 %v2440_v9  ;;  %v1135_v47 = vpop.f32.mrb[16].mxu0 }
 0x241   : > { %v1136_v49 = vadd.f32 %v2088_v46, %v1135_v47  ;;  %v2249_v50 = vpop.f32.mrb[17].mxu0 }
 0x242   : > { %v1138_v51 = vpop.f32.mrb[18].mxu0  ;;  %v1187_v52 = vpop.f32.mrb[16].mxu1 }
 0x243   : > { %v1553_v53 = vpack.c.bf16 %v1136_v49, %v1136_v49  ;;  %v2250_v54 = vpop.f32.mrb[19].mxu0  ;;  %v1188_v55 = vadd.f32 %v2089_v48, %v1187_v52  ;;  %v2257_v56 = vpop.f32.mrb[17].mxu1 }
 0x244   : > { %v1190_v57 = vpop.f32.mrb[18].mxu1 }
 0x245   : > { %2290 = vmatmul.mubr.msk.bf16.vlgmr.msra.gmra.mrb[28].mxu0 %vm1309_vm2, %v1303_v44  ;;  %2296 = vmatmul.mubr.msk.bf16.vlgmr.msra.gmra.mrb[28].mxu1 %vm1309_vm2, %v1304_v45  ;;  %v1562_v58 = vsel %vm1560_vm3, %v1553_v53, 0  ;;  %v1554_v59 = vpack.c.bf16 %v1188_v55, %v1188_v55  ;;  %v2258_v60 = vpop.f32.mrb[19].mxu1 }
 0x246   : > { %2301 = vmatprep.mubr.msk.bf16.mxu0 %vm2441_vm1, %v2440_v9  ;;  %2307 = vmatprep.mubr.msk.bf16.mxu1 %vm2441_vm1, %v2440_v9 }
 0x247   : > { %2300 = vmatpush3.bf16.msra.mxu0 %v1562_v58  ;;  %v1608_v61 = vsel %vm1560_vm3, %v1554_v59, 0 }
 0x248   : > { %2311 = vmatprep.subr.bf16.mxu0 %v2440_v9  ;;  %2306 = vmatpush3.bf16.msra.mxu1 %v1608_v61  ;;  %v2748_v62 = vpop.f32.mrb[20].mxu0  ;;  %v2090_v61 = vld [vmem:[%s2850_s10 + $0x2] ss:$0 sm:$0xff] }
 0x249   : > { %2317 = vmatprep.subr.bf16.mxu1 %v2440_v9  ;;  %v2265_v1 = vpop.f32.mrb[21].mxu0 }
 0x24a   : > { %v2750_v63 = vpop.f32.mrb[20].mxu1  ;;  %v1242_v3 = vpop.f32.mrb[22].mxu0  ;;  %v1240_v1 = vadd.f32 %v2090_v61, %v2748_v62 }
 0x24b   : > { %v2273_v2 = vpop.f32.mrb[21].mxu1  ;;  %v2266_v5 = vpop.f32.mrb[23].mxu0  ;;  %v2091_v3 = vld [vmem:[%s2850_s10 + $0x3] ss:$0 sm:$0xff] }
 0x24c   : > { %v1294_v4 = vpop.f32.mrb[22].mxu1  ;;  %v1292_v7 = vadd.f32 %v2091_v3, %v2750_v63 }
 0x24d   : > { %v2274_v6 = vpop.f32.mrb[23].mxu1 }
 0x24e   : > { %v1555_v6 = vpack.c.bf16 %v1240_v1, %v1240_v1  ;;  %v1556_v13 = vpack.c.bf16 %v1292_v7, %v1292_v7 }
 0x250   : > { %v1654_v12 = vsel %vm1560_vm3, %v1555_v6, 0  ;;  %v1700_v63 = vsel %vm1560_vm3, %v1556_v13, 0  ;;  %v2116_v6 = vld [vmem:[%s2852_s12] ss:$0 sm:$0xff] }
 0x310   : > { %v1350_v15 = vpop.f32.mrb[24].mxu0  ;;  %v1396_v16 = vpop.f32.mrb[24].mxu1 }
 0x311   : > { %v1501_v17 = vsel %vm1500_vm5, -1e+18, %v1350_v15  ;;  %v2279_v18 = vpop.f32.mrb[25].mxu0  ;;  %v2285_v19 = vpop.f32.mrb[25].mxu1  ;;  %v1502_v23 = vsel %vm1500_vm5, -1e+18, %v1396_v16 }
 0x312   : > { %v1353_v20 = vpop.f32.mrb[26].mxu0  ;;  %v1399_v21 = vpop.f32.mrb[26].mxu1  ;;  %v1505_v22 = vsel %vm1309_vm2, %v1501_v17, -inf  ;;  %v1508_v26 = vsel %vm1309_vm2, %v1502_v23, -inf }
 0x313   : > { %v2286_v24 = vpop.f32.mrb[27].mxu1  ;;  %1506 = vmax.xlane.f32.xlu1 %v1505_v22  ;;  %v2280_v25 = vpop.f32.mrb[27].mxu0 }
 0x314   : > { %v1748_v25 = vld [vmem:[%s2851_s11 + $0x8] sm:$0xf] }
 0x317   : > { %1509 = vmax.xlane.f32.xlu1 %v1508_v26 }
 0x318   : > { %v1442_v27 = vpop.f32.mrb[28].mxu0  ;;  %v1488_v28 = vpop.f32.mrb[28].mxu1 }
 0x319   : > { %v1503_v29 = vsel %vm1500_vm5, -1e+18, %v1442_v27  ;;  %v1504_v30 = vsel %vm1500_vm5, -1e+18, %v1488_v28  ;;  %v2291_v31 = vpop.f32.mrb[29].mxu0  ;;  %v2297_v32 = vpop.f32.mrb[29].mxu1 }
 0x31a   : > { %v1445_v33 = vpop.f32.mrb[30].mxu0  ;;  %v1491_v34 = vpop.f32.mrb[30].mxu1  ;;  %v1514_v35 = vsel %vm1309_vm2, %v1504_v30, -inf  ;;  %v1511_v36 = vsel %vm1309_vm2, %v1503_v29, -inf  ;;  %v1749_v31 = vld [vmem:[%s2851_s11 + $0xc] sm:$0xf] }
 0x31b   : > { %v2298_v37 = vpop.f32.mrb[31].mxu1  ;;  %1515 = vmax.xlane.f32.xlu1 %v1514_v35  ;;  %1512 = vmax.xlane.f32.xlu0 %v1511_v36  ;;  %v2292_v38 = vpop.f32.mrb[31].mxu0  ;;  %v1892_v36 = vsel %vm1560_vm3, %v1749_v31, 0 }
 0x3a0   : > { %v1507_v39 = vpop.xlane.xlu1 %1506 }
 0x3a1   : > { %v1517_v40 = vsub.f32 %v1501_v17, %v1507_v39  ;;  %v1746_v17 = vld [vmem:[%s2851_s11] sm:$0xf] }
 0x3a2   : > { %v1754_v21 = vsel %vm1560_vm3, %v1746_v17, 0 }
 0x3a3   : > { %v1521_v41 = vmul.f32 1.442695, %v1517_v40 }
 0x3a4   : > { %v1510_v42 = vpop.xlane.xlu1 %1509 }
 0x3a5   : > { %2400 = vpow2.f32 %v1521_v41  ;;  %v1518_v43 = vsub.f32 %v1502_v23, %v1510_v42  ;;  %v1747_v23 = vld [vmem:[%s2851_s11 + $0x4] sm:$0xf] }
 0x3a6   : > { %v1800_v24 = vsel %vm1560_vm3, %v1747_v23, 0 }
 0x3a7   : > { %v1523_v44 = vmul.f32 1.442695, %v1518_v43 }
 0x3a8   : > { %v1516_v45 = vpop.xlane.xlu1 %1515  ;;  %v1513_v46 = vpop.xlane.xlu0 %1512 }
 0x3a9   : > { %2402 = vpow2.f32 %v1523_v44  ;;  %v1520_v47 = vsub.f32 %v1504_v30, %v1516_v45  ;;  %v1519_v48 = vsub.f32 %v1503_v29, %v1513_v46  ;;  %v1846_v29 = vsel %vm1560_vm3, %v1748_v25, 0 }
 0x3ab   : > { %v1527_v49 = vmul.f32 1.442695, %v1520_v47  ;;  %v1525_v50 = vmul.f32 1.442695, %v1519_v48 }
 0x3ad   : > { %2404 = vpow2.f32 %v1527_v49 }
 0x3ae   : > { %2406 = vpow2.f32 %v1525_v50 }
 0x3af   : > { %v2401_v51 = vpop.eup %2400 }
 0x3b0   : > { %v1529_v52 = vsel %vm1309_vm2, %v2401_v51, 0.0 }
 0x3b1   : > { %1530 = vadd.xlane.f32.xlu0 %v1529_v52 }
 0x3b3   : > { %v2403_v53 = vpop.eup %2402 }
 0x3b4   : > { %v1532_v54 = vsel %vm1309_vm2, %v2403_v53, 0.0 }
 0x3b5   : > { %1533 = vadd.xlane.f32.xlu1 %v1532_v54 }
 0x3b7   : > { %v2405_v55 = vpop.eup %2404 }
 0x3b8   : > { %v2407_v56 = vpop.eup %2406  ;;  %v1538_v57 = vsel %vm1309_vm2, %v2405_v55, 0.0 }
 0x3b9   : > { %1539 = vadd.xlane.f32.xlu1 %v1538_v57  ;;  %v1535_v58 = vsel %vm1309_vm2, %v2407_v56, 0.0 }
 0x3ba   : > { %1536 = vadd.xlane.f32.xlu0 %v1535_v58 }
 0x43e   : > { %v1531_v59 = vpop.xlane.xlu0 %1530 }
 0x43f   : > { %2408 = vrcp.f32 %v1531_v59 }
 0x442   : > { %v1534_v60 = vpop.xlane.xlu1 %1533 }
 0x443   : > { %2410 = vrcp.f32 %v1534_v60 }
 0x446   : > { %v1540_v2 = vpop.xlane.xlu1 %1539 }
 0x447   : > { %2412 = vrcp.f32 %v1540_v2  ;;  %v1537_v4 = vpop.xlane.xlu0 %1536 }
 0x448   : > { %2414 = vrcp.f32 %v1537_v4 }
 0x449   : > { %v2409_v5 = vpop.eup %2408 }
 0x44a   : > { %v1545_v8 = vmul.f32 %v2409_v5, %v2401_v51 }
 0x44c   : > { %v1549_v10 = vpack.c.bf16 %v1545_v8, %v1545_v8 }
 0x44d   : > { %v2411_v11 = vpop.eup %2410 }
 0x44e   : > { %v1546_v14 = vmul.f32 %v2411_v11, %v2403_v53  ;;  %2302 = vmatmul.mubr.msk.bf16.vlgmr.msra.gmra.mrb[32].mxu0 %vm1309_vm2, %v1549_v10 }
 0x44f   : > { %2312 = vmatpush3.bf16.msra.mxu0 %v1654_v12  ;;  %2313 = vmatprep.mubr.msk.bf16.mxu0 %vm2441_vm1, %v2440_v9 }
 0x450   : > { %v1550_v62 = vpack.c.bf16 %v1546_v14, %v1546_v14  ;;  %2323 = vmatprep.subr.bf16.mxu0 %v2440_v9 }
 0x451   : > { %v2413_v15 = vpop.eup %2412 }
 0x452   : > { %v2415_v16 = vpop.eup %2414  ;;  %2308 = vmatmul.mubr.msk.bf16.vlgmr.msra.gmra.mrb[32].mxu1 %vm1309_vm2, %v1550_v62  ;;  %v1548_v19 = vmul.f32 %v2413_v15, %v2405_v55 }
 0x453   : > { %v1547_v18 = vmul.f32 %v2415_v16, %v2407_v56  ;;  %2318 = vmatpush3.bf16.msra.mxu1 %v1700_v63  ;;  %2319 = vmatprep.mubr.msk.bf16.mxu1 %vm2441_vm1, %v2440_v9 }
 0x454   : > { %2329 = vmatprep.subr.bf16.mxu1 %v2440_v9  ;;  %v1552_v22 = vpack.c.bf16 %v1548_v19, %v1548_v19 }
 0x455   : > { %v1551_v20 = vpack.c.bf16 %v1547_v18, %v1547_v18 }
 0x457   : > { %2314 = vmatmul.mubr.msk.bf16.vlgmr.msra.gmra.mrb[36].mxu0 %vm1309_vm2, %v1551_v20 }
 0x458   : > { %2324 = vmatpush3.bf16.msra.mxu0 %v1754_v21  ;;  %2325 = vmatprep.mubr.msk.bf16.mxu0 %vm2441_vm1, %v2440_v9 }
 0x459   : > { %2335 = vmatprep.subr.bf16.mxu0 %v2440_v9 }
 0x45a   : > { %2320 = vmatmul.mubr.msk.bf16.vlgmr.msra.gmra.mrb[36].mxu1 %vm1309_vm2, %v1552_v22 }
 0x45b   : > { %2331 = vmatprep.mubr.msk.bf16.mxu1 %vm2441_vm1, %v2440_v9  ;;  %2330 = vmatpush3.bf16.msra.mxu1 %v1800_v24 }
 0x45c   : > { %2341 = vmatprep.subr.bf16.mxu1 %v2440_v9 }
 0x521   : > { %v1598_v26 = vpop.f32.mrb[32].mxu0 }
 0x522   : > { %v1742_v27 = vpack.c.bf16 %v1598_v26, %v1598_v26  ;;  %v2303_v28 = vpop.f32.mrb[33].mxu0 }
 0x523   : > { %v1601_v30 = vpop.f32.mrb[34].mxu0 }
 0x524   : > { %v2304_v32 = vpop.f32.mrb[35].mxu0  ;;  %2326 = vmatmul.mubr.msk.bf16.vlgmr.msra.gmra.mrb[40].mxu0 %vm1309_vm2, %v1742_v27 }
 0x525   : > { %v1644_v33 = vpop.f32.mrb[32].mxu1  ;;  %2336 = vmatpush3.bf16.msra.mxu0 %v1846_v29  ;;  %2337 = vmatprep.mubr.msk.bf16.mxu0 %vm2441_vm1, %v2440_v9 }
 0x526   : > { %v1743_v34 = vpack.c.bf16 %v1644_v33, %v1644_v33  ;;  %v2309_v35 = vpop.f32.mrb[33].mxu1 }
 0x527   : > { %v1647_v37 = vpop.f32.mrb[34].mxu1 }
 0x528   : > { %v2310_v38 = vpop.f32.mrb[35].mxu1  ;;  %2332 = vmatmul.mubr.msk.bf16.vlgmr.msra.gmra.mrb[40].mxu1 %vm1309_vm2, %v1743_v34 }
 0x529   : > { %2342 = vmatpush3.bf16.msra.mxu1 %v1892_v36  ;;  %2343 = vmatprep.mubr.msk.bf16.mxu1 %vm2441_vm1, %v2440_v9 }
 0x52a   : > { %v1690_v39 = vpop.f32.mrb[36].mxu0 }
 0x52b   : > { %v1744_v40 = vpack.c.bf16 %v1690_v39, %v1690_v39  ;;  %v2315_v41 = vpop.f32.mrb[37].mxu0 }
 0x52c   : > { %v1693_v42 = vpop.f32.mrb[38].mxu0 }
 0x52d   : > { %v2316_v43 = vpop.f32.mrb[39].mxu0  ;;  %2338 = vmatmul.mubr.msk.bf16.vlgmr.msra.gmra.mrb[44].mxu0 %vm1309_vm2, %v1744_v40  ;;  %v1736_v44 = vpop.f32.mrb[36].mxu1 }
 0x52e   : > { %v1745_v45 = vpack.c.bf16 %v1736_v44, %v1736_v44  ;;  %v2321_v46 = vpop.f32.mrb[37].mxu1 }
 0x52f   : > { %v1739_v47 = vpop.f32.mrb[38].mxu1 }
 0x530   : > { %v2322_v48 = vpop.f32.mrb[39].mxu1  ;;  %2344 = vmatmul.mubr.msk.bf16.vlgmr.msra.gmra.mrb[44].mxu1 %vm1309_vm2, %v1745_v45 }
 0x5f7   : > { %v1790_v49 = vpop.f32.mrb[40].mxu0 }
 0x5f8   : > { %v2327_v50 = vpop.f32.mrb[41].mxu0  ;;  %v1934_v9 = vsel %vm504_vm0, %v1790_v49, 0.0 }
 0x5f9   : > { %v1793_v51 = vpop.f32.mrb[42].mxu0 }
 0x5fa   : > { %v2328_v52 = vpop.f32.mrb[43].mxu0 }
 0x5fb   : > { %v1836_v53 = vpop.f32.mrb[40].mxu1 }
 0x5fc   : > { %v1935_v54 = vsel %vm504_vm0, %v1836_v53, 0.0  ;;  %v2333_v55 = vpop.f32.mrb[41].mxu1 }
 0x5fd   : > { %v1936_v56 = vadd.f32 %v1935_v54, %v1934_v9  ;;  %v1839_v57 = vpop.f32.mrb[42].mxu1 }
 0x5fe   : > { %v2334_v58 = vpop.f32.mrb[43].mxu1 }
 0x600   : > { %v1882_v59 = vpop.f32.mrb[44].mxu0 }
 0x601   : > { %v1937_v60 = vsel %vm504_vm0, %v1882_v59, 0.0  ;;  %v2339_v61 = vpop.f32.mrb[45].mxu0 }
 0x602   : > { %v1938_v1 = vadd.f32 %v1937_v60, %v1936_v56  ;;  %v1885_v2 = vpop.f32.mrb[46].mxu0 }
 0x603   : > { %v2340_v3 = vpop.f32.mrb[47].mxu0  ;;  %v1928_v4 = vpop.f32.mrb[44].mxu1 }
 0x604   : > { %v1939_v5 = vsel %vm504_vm0, %v1928_v4, 0.0  ;;  %v2345_v7 = vpop.f32.mrb[45].mxu1 }
 0x605   : > { %v1940_v8 = vadd.f32 %v1939_v5, %v1938_v1  ;;  %v1931_v10 = vpop.f32.mrb[46].mxu1 }
 0x606   : > { %v2346_v11 = vpop.f32.mrb[47].mxu1 }
 0x607   : > { %v1948_v12 = vadd.f32 %v2116_v6, %v1940_v8 }
 0x609   : > { %v1949_v13 = vadd.f32 %v1948_v12, %v2540_v0 }
 0x60b   : > { %1950 = vst.msk [vmem:[%s497_s24] sm:$0xff] %vm504_vm0, %v1949_v13 }
 0x60c PF: > { %s23_s27 = sadd.s32 1, %s2438_s27   ;;  %s2854_s25 = smov %s2434_s26 }
 0x60d   : > { %p20_p5 = scmp.ge.s32.totalorder %s23_s27, 4   ;;  %s2855_s26 = smov %s2857_s28 }
 0x60f   :  { %22 = sbr.rel (!%p20_p5) target bundleno = 2 (0x2), region = 108 }

</bundles_post_ra>
